<compile_context>
chip_gen: v5e
topology: v5e:2x2
jax: 0.10.0
libtpu: 0.0.40
codegen_flags: <defaults>
</compile_context>

<pallas_src>
import jax
import jax.numpy as jnp
from jax.experimental import pallas as pl
from jax.experimental.pallas import tpu as pltpu


# ---------------------------------------------------------------- helpers ---
def _full_spec(shape):
    # Whole-array block (no grid), resident in VMEM.
    return pl.BlockSpec(shape, lambda: (0,) * len(shape))


_PARALLEL_BATCH = pltpu.CompilerParams(dimension_semantics=("parallel",))


# ------------------------------------------------------- conv stage kernels ---
def _conv_kernel(cols_ref, w_ref, b_ref, o_ref):
    # Per sample: (O, K) @ (K, M) + (O, 1) -> ReLU, M = Ho*Wo on the lane axis.
    y = jnp.dot(w_ref[...], cols_ref[...], preferred_element_type=jnp.float32)
    o_ref[...] = jnp.maximum(y + b_ref[...], 0.0)


def _conv_pair_kernel(cols_ref, wa_ref, ba_ref, wb_ref, bb_ref, oa_ref, ob_ref):
    # conv (kxk via im2col) + ReLU fused with the following 1x1 conv + ReLU.
    ya = jnp.dot(wa_ref[...], cols_ref[...], preferred_element_type=jnp.float32)
    ya = jnp.maximum(ya + ba_ref[...], 0.0)
    oa_ref[...] = ya
    yb = jnp.dot(wb_ref[...], ya, preferred_element_type=jnp.float32)
    ob_ref[...] = jnp.maximum(yb + bb_ref[...], 0.0)


def conv_stage(cols, w, b):
    """cols: (B, K, M) -> (B, O, M) with fused bias + ReLU. Grid over batch."""
    B, K, M = cols.shape
    O = w.shape[0]
    return pl.pallas_call(
        _conv_kernel,
        out_shape=jax.ShapeDtypeStruct((B, O, M), jnp.float32),
        grid=(B,),
        in_specs=[pl.BlockSpec((None, K, M), lambda i: (i, 0, 0)),
                  pl.BlockSpec((O, K), lambda i: (0, 0)),
                  pl.BlockSpec((O, 1), lambda i: (0, 0))],
        out_specs=pl.BlockSpec((None, O, M), lambda i: (i, 0, 0)),
        compiler_params=_PARALLEL_BATCH,
    )(cols, w, b)


def conv_stage_pair(cols, wa, ba, wb, bb):
    """cols: (B, K, M) -> (conv_a out, conv_b(1x1) out), both (B, O, M)."""
    B, K, M = cols.shape
    Oa, Ob = wa.shape[0], wb.shape[0]
    return pl.pallas_call(
        _conv_pair_kernel,
        out_shape=(jax.ShapeDtypeStruct((B, Oa, M), jnp.float32),
                   jax.ShapeDtypeStruct((B, Ob, M), jnp.float32)),
        grid=(B,),
        in_specs=[pl.BlockSpec((None, K, M), lambda i: (i, 0, 0)),
                  pl.BlockSpec((Oa, K), lambda i: (0, 0)),
                  pl.BlockSpec((Oa, 1), lambda i: (0, 0)),
                  pl.BlockSpec((Ob, Oa), lambda i: (0, 0)),
                  pl.BlockSpec((Ob, 1), lambda i: (0, 0))],
        out_specs=(pl.BlockSpec((None, Oa, M), lambda i: (i, 0, 0)),
                   pl.BlockSpec((None, Ob, M), lambda i: (i, 0, 0))),
        compiler_params=_PARALLEL_BATCH,
    )(cols, wa, ba, wb, bb)


# --------------------------------------------------------- fused FC head ---
def _fc_head_kernel(x_ref, w1_ref, b1_ref, w2_ref, b2_ref, w3_ref, b3_ref,
                    o1_ref, o2_ref, o3_ref, ol_ref):
    h1 = jnp.dot(x_ref[...], w1_ref[...], preferred_element_type=jnp.float32)
    h1 = jnp.maximum(h1 + b1_ref[...], 0.0)
    o1_ref[...] = h1
    h2 = jnp.dot(h1, w2_ref[...], preferred_element_type=jnp.float32)
    h2 = jnp.maximum(h2 + b2_ref[...], 0.0)
    o2_ref[...] = h2
    h3 = jnp.dot(h2, w3_ref[...], preferred_element_type=jnp.float32) + b3_ref[...]
    o3_ref[...] = h3
    s = h3 - jnp.max(h3, axis=-1, keepdims=True)
    ol_ref[...] = s - jnp.log(jnp.sum(jnp.exp(s), axis=-1, keepdims=True))


def fc_head(x, w1, b1, w2, b2, w3, b3):
    B, K = x.shape
    N1, N2, N3 = w1.shape[1], w2.shape[1], w3.shape[1]
    return pl.pallas_call(
        _fc_head_kernel,
        out_shape=(jax.ShapeDtypeStruct((B, N1), jnp.float32),
                   jax.ShapeDtypeStruct((B, N2), jnp.float32),
                   jax.ShapeDtypeStruct((B, N3), jnp.float32),
                   jax.ShapeDtypeStruct((B, N3), jnp.float32)),
        in_specs=[_full_spec((B, K)),
                  _full_spec((K, N1)), _full_spec((1, N1)),
                  _full_spec((N1, N2)), _full_spec((1, N2)),
                  _full_spec((N2, N3)), _full_spec((1, N3))],
        out_specs=(_full_spec((B, N1)), _full_spec((B, N2)),
                   _full_spec((B, N3)), _full_spec((B, N3))),
    )(x, w1, b1, w2, b2, w3, b3)


# --------------------------------------------------------------- XLA glue ---
def _im2col_nchw(x, kh, kw):
    """NCHW -> (B, C*kh*kw, Ho*Wo); column order (c, dh, dw) = PyTorch flatten."""
    B, C, H, W = x.shape
    Ho, Wo = H - kh + 1, W - kw + 1
    patches = [x[:, :, dh:dh + Ho, dw:dw + Wo]
               for dh in range(kh) for dw in range(kw)]
    cols = jnp.stack(patches, axis=2)              # (B, C, kh*kw, Ho, Wo)
    return cols.reshape(B, C * kh * kw, Ho * Wo), (Ho, Wo)


def _max_pool2d_nchw(x):
    """F.max_pool2d(x, 2) (floor, no padding) on NCHW."""
    B, C, H, W = x.shape
    Ho, Wo = H // 2, W // 2
    xc = x[:, :, :2 * Ho, :2 * Wo]
    return xc.reshape(B, C, Ho, 2, Wo, 2).max(axis=(3, 5))


# ------------------------------------------------------------------ params ---
def init_params(key):
    def conv_init(k, o, c, kh, kw):
        k1, k2 = jax.random.split(k)
        bound = 1.0 / float(c * kh * kw) ** 0.5
        w = jax.random.uniform(k1, (o, c, kh, kw), jnp.float32, -bound, bound)
        b = jax.random.uniform(k2, (o,), jnp.float32, -bound, bound)
        return w, b

    def linear_init(k, o, i):
        k1, k2 = jax.random.split(k)
        bound = 1.0 / float(i) ** 0.5
        w = jax.random.uniform(k1, (o, i), jnp.float32, -bound, bound)
        b = jax.random.uniform(k2, (o,), jnp.float32, -bound, bound)
        return w, b

    ks = jax.random.split(key, 10)
    p = {}
    p["conv1_w"], p["conv1_b"] = conv_init(ks[0], 5, 1, 2, 2)
    p["conv2_w"], p["conv2_b"] = conv_init(ks[1], 5, 5, 1, 1)
    p["conv3_w"], p["conv3_b"] = conv_init(ks[2], 10, 5, 2, 2)
    p["conv4_w"], p["conv4_b"] = conv_init(ks[3], 10, 10, 1, 1)
    p["conv5_w"], p["conv5_b"] = conv_init(ks[4], 20, 10, 2, 2)
    p["conv6_w"], p["conv6_b"] = conv_init(ks[5], 40, 20, 2, 2)
    p["conv7_w"], p["conv7_b"] = conv_init(ks[6], 80, 40, 1, 1)
    p["fc1_w"], p["fc1_b"] = linear_init(ks[7], 160, 320)
    p["fc2_w"], p["fc2_b"] = linear_init(ks[8], 50, 160)
    p["fc3_w"], p["fc3_b"] = linear_init(ks[9], 10, 50)
    return p


def prepare_params(p):
    """One-time weight layout prep (kernel-friendly shapes, no per-forward .T)."""
    q = {}
    for name in ["conv1", "conv2", "conv3", "conv4", "conv5", "conv6", "conv7"]:
        w = p[f"{name}_w"]
        o = w.shape[0]
        q[f"{name}_wm"] = w.reshape(o, -1)                 # (O, C*kh*kw)
        q[f"{name}_bm"] = p[f"{name}_b"].reshape(o, 1)     # (O, 1)
    for name in ["fc1", "fc2", "fc3"]:
        q[f"{name}_wm"] = p[f"{name}_w"].T                 # (K, N)
        q[f"{name}_bm"] = p[f"{name}_b"].reshape(1, -1)    # (1, N)
    return q


# ----------------------------------------------------------------- forward ---
@jax.jit
def net10_forward(q, x):
    # x: (B, 1, 28, 28) NCHW so the flatten hits 320 features.
    B = x.shape[0]

    cols1, (H1, W1) = _im2col_nchw(x, 2, 2)                          # (B, 4, 729)
    h1f, h2f = conv_stage_pair(cols1, q["conv1_wm"], q["conv1_bm"],
                               q["conv2_wm"], q["conv2_bm"])
    h1 = h1f.reshape(B, 5, H1, W1)                                   # (B, 5, 27, 27)
    h2 = h2f.reshape(B, 5, H1, W1)

    p2 = _max_pool2d_nchw(h2)                                        # (B, 5, 13, 13)
    cols3, (H3, W3) = _im2col_nchw(p2, 2, 2)                         # (B, 20, 144)
    h3f, h4f = conv_stage_pair(cols3, q["conv3_wm"], q["conv3_bm"],
                               q["conv4_wm"], q["conv4_bm"])
    h3 = h3f.reshape(B, 10, H3, W3)                                  # (B, 10, 12, 12)
    h4 = h4f.reshape(B, 10, H3, W3)

    p4 = _max_pool2d_nchw(h4)                                        # (B, 10, 6, 6)
    cols5, (H5, W5) = _im2col_nchw(p4, 2, 2)                         # (B, 40, 25)
    h5f = conv_stage(cols5, q["conv5_wm"], q["conv5_bm"])
    h5 = h5f.reshape(B, 20, H5, W5)                                  # (B, 20, 5, 5)

    cols6, (H6, W6) = _im2col_nchw(h5, 2, 2)                         # (B, 80, 16)
    h6f, h7f = conv_stage_pair(cols6, q["conv6_wm"], q["conv6_bm"],
                               q["conv7_wm"], q["conv7_bm"])
    h6 = h6f.reshape(B, 40, H6, W6)                                  # (B, 40, 4, 4)
    h7 = h7f.reshape(B, 80, H6, W6)                                  # (B, 80, 4, 4)

    p7 = _max_pool2d_nchw(h7)                                        # (B, 80, 2, 2)
    flat = p7.reshape(-1, 320)                                       # view(-1, 320)

    hf1, hf2, hf3, out = fc_head(flat,
                                 q["fc1_wm"], q["fc1_bm"],
                                 q["fc2_wm"], q["fc2_bm"],
                                 q["fc3_wm"], q["fc3_bm"])
    return (h1, h2, h3, h4, h5, h6, h7, hf1, hf2, hf3, out)


if __name__ == "__main__":
    key = jax.random.PRNGKey(0)
    pk, xk = jax.random.split(key)
    params = init_params(pk)
    prep = prepare_params(params)
    x = jax.random.normal(xk, (2, 1, 28, 28), dtype=jnp.float32)
    outs = net10_forward(prep, x)
    jax.block_until_ready(outs)
    assert outs[0].shape == (2, 5, 27, 27)
    assert outs[-1].shape == (2, 10)
    print("KERNEL_OK")
</pallas_src>

<mosaic_0001>
module attributes {stable_mosaic.version = 11 : i64} {
  func.func @_conv_pair_kernel(%arg0: i32, %arg1: memref<1x4x729xf32, #tpu.memory_space<vmem>>, %arg2: memref<5x4xf32, #tpu.memory_space<vmem>>, %arg3: memref<5x1xf32, #tpu.memory_space<vmem>>, %arg4: memref<5x5xf32, #tpu.memory_space<vmem>>, %arg5: memref<5x1xf32, #tpu.memory_space<vmem>>, %arg6: memref<1x5x729xf32, #tpu.memory_space<vmem>>, %arg7: memref<1x5x729xf32, #tpu.memory_space<vmem>>) attributes {dimension_semantics = [#tpu.dimension_semantics<parallel>], iteration_bounds = array<i64: 2>, scalar_prefetch = 0 : i64, scratch_operands = 0 : i64, tpu.core_type = #tpu.core_type<tc>, window_params = [{transform_indices = @transform_0, window_bounds = array<i64: 1, 4, 729>}, {pipeline_mode = #tpu.pipeline_mode<synchronous>, transform_indices = @transform_1, window_bounds = array<i64: 5, 4>}, {pipeline_mode = #tpu.pipeline_mode<synchronous>, transform_indices = @transform_2, window_bounds = array<i64: 5, 1>}, {pipeline_mode = #tpu.pipeline_mode<synchronous>, transform_indices = @transform_3, window_bounds = array<i64: 5, 5>}, {pipeline_mode = #tpu.pipeline_mode<synchronous>, transform_indices = @transform_4, window_bounds = array<i64: 5, 1>}, {transform_indices = @transform_5, window_bounds = array<i64: 1, 5, 729>}, {transform_indices = @transform_6, window_bounds = array<i64: 1, 5, 729>}]} {
    %c0 = arith.constant 0 : index
    %c0_0 = arith.constant 0 : index
    %0 = vector.load %arg2[%c0, %c0_0] : memref<5x4xf32, #tpu.memory_space<vmem>>, vector<5x4xf32>
    %c0_1 = arith.constant 0 : index
    %c0_2 = arith.constant 0 : index
    %c0_3 = arith.constant 0 : index
    %1 = vector.load %arg1[%c0_1, %c0_2, %c0_3] : memref<1x4x729xf32, #tpu.memory_space<vmem>>, vector<1x4x729xf32>
    %2 = vector.shape_cast %1 : vector<1x4x729xf32> to vector<4x729xf32>
    %cst = arith.constant dense<0.000000e+00> : vector<5x729xf32>
    %3 = tpu.matmul %0, %2, %cst {dimension_numbers = #tpu.dot_dimension_numbers<[1], [0], [0], [1], [0, 0, 1, 1], [], []>} : vector<5x4xf32>, vector<4x729xf32>, vector<5x729xf32> -> vector<5x729xf32>
    %c0_4 = arith.constant 0 : index
    %c0_5 = arith.constant 0 : index
    %4 = vector.load %arg3[%c0_4, %c0_5] : memref<5x1xf32, #tpu.memory_space<vmem>>, vector<5x1xf32>
    %5 = vector.broadcast %4 : vector<5x1xf32> to vector<5x729xf32>
    %6 = arith.addf %3, %5 : vector<5x729xf32>
    %cst_6 = arith.constant 0.000000e+00 : f32
    %7 = vector.broadcast %cst_6 : f32 to vector<5x729xf32>
    %8 = arith.maximumf %6, %7 : vector<5x729xf32>
    %c0_7 = arith.constant 0 : index
    %c0_8 = arith.constant 0 : index
    %c0_9 = arith.constant 0 : index
    %9 = vector.load %arg6[%c0_7, %c0_8, %c0_9] : memref<1x5x729xf32, #tpu.memory_space<vmem>>, vector<1x5x729xf32>
    %10 = vector.shape_cast %9 : vector<1x5x729xf32> to vector<5x729xf32>
    %11 = vector.shape_cast %8 : vector<5x729xf32> to vector<1x5x729xf32>
    tpu.vector_store %arg6[%c0_7, %c0_8, %c0_9], %11 {strides = array<i32>} : memref<1x5x729xf32, #tpu.memory_space<vmem>>, vector<1x5x729xf32>,
    %c0_10 = arith.constant 0 : index
    %c0_11 = arith.constant 0 : index
    %12 = vector.load %arg4[%c0_10, %c0_11] : memref<5x5xf32, #tpu.memory_space<vmem>>, vector<5x5xf32>
    %cst_12 = arith.constant dense<0.000000e+00> : vector<5x729xf32>
    %13 = tpu.matmul %12, %8, %cst_12 {dimension_numbers = #tpu.dot_dimension_numbers<[1], [0], [0], [1], [0, 0, 1, 1], [], []>} : vector<5x5xf32>, vector<5x729xf32>, vector<5x729xf32> -> vector<5x729xf32>
    %c0_13 = arith.constant 0 : index
    %c0_14 = arith.constant 0 : index
    %14 = vector.load %arg5[%c0_13, %c0_14] : memref<5x1xf32, #tpu.memory_space<vmem>>, vector<5x1xf32>
    %15 = vector.broadcast %14 : vector<5x1xf32> to vector<5x729xf32>
    %16 = arith.addf %13, %15 : vector<5x729xf32>
    %cst_15 = arith.constant 0.000000e+00 : f32
    %17 = vector.broadcast %cst_15 : f32 to vector<5x729xf32>
    %18 = arith.maximumf %16, %17 : vector<5x729xf32>
    %c0_16 = arith.constant 0 : index
    %c0_17 = arith.constant 0 : index
    %c0_18 = arith.constant 0 : index
    %19 = vector.load %arg7[%c0_16, %c0_17, %c0_18] : memref<1x5x729xf32, #tpu.memory_space<vmem>>, vector<1x5x729xf32>
    %20 = vector.shape_cast %19 : vector<1x5x729xf32> to vector<5x729xf32>
    %21 = vector.shape_cast %18 : vector<5x729xf32> to vector<1x5x729xf32>
    tpu.vector_store %arg7[%c0_16, %c0_17, %c0_18], %21 {strides = array<i32>} : memref<1x5x729xf32, #tpu.memory_space<vmem>>, vector<1x5x729xf32>,
    return
  }
  func.func @transform_0(%arg0: i32) -> (i32, i32, i32) {
    %c0_i32 = arith.constant 0 : i32
    %c0_i32_0 = arith.constant 0 : i32
    %c0_i32_1 = arith.constant 0 : i32
    return %arg0, %c0_i32, %c0_i32_0 : i32, i32, i32
  }
  func.func @transform_1(%arg0: i32) -> (i32, i32) {
    %c0_i32 = arith.constant 0 : i32
    %c0_i32_0 = arith.constant 0 : i32
    %c0_i32_1 = arith.constant 0 : i32
    return %c0_i32, %c0_i32_0 : i32, i32
  }
  func.func @transform_2(%arg0: i32) -> (i32, i32) {
    %c0_i32 = arith.constant 0 : i32
    %c0_i32_0 = arith.constant 0 : i32
    %c0_i32_1 = arith.constant 0 : i32
    return %c0_i32, %c0_i32_0 : i32, i32
  }
  func.func @transform_3(%arg0: i32) -> (i32, i32) {
    %c0_i32 = arith.constant 0 : i32
    %c0_i32_0 = arith.constant 0 : i32
    %c0_i32_1 = arith.constant 0 : i32
    return %c0_i32, %c0_i32_0 : i32, i32
  }
  func.func @transform_4(%arg0: i32) -> (i32, i32) {
    %c0_i32 = arith.constant 0 : i32
    %c0_i32_0 = arith.constant 0 : i32
    %c0_i32_1 = arith.constant 0 : i32
    return %c0_i32, %c0_i32_0 : i32, i32
  }
  func.func @transform_5(%arg0: i32) -> (i32, i32, i32) {
    %c0_i32 = arith.constant 0 : i32
    %c0_i32_0 = arith.constant 0 : i32
    %c0_i32_1 = arith.constant 0 : i32
    return %arg0, %c0_i32, %c0_i32_0 : i32, i32, i32
  }
  func.func @transform_6(%arg0: i32) -> (i32, i32, i32) {
    %c0_i32 = arith.constant 0 : i32
    %c0_i32_0 = arith.constant 0 : i32
    %c0_i32_1 = arith.constant 0 : i32
    return %arg0, %c0_i32, %c0_i32_0 : i32, i32, i32
  }
}

module attributes {stable_mosaic.version = 11 : i64} {
  func.func @_conv_pair_kernel(%arg0: i32, %arg1: memref<1x20x144xf32, #tpu.memory_space<vmem>>, %arg2: memref<10x20xf32, #tpu.memory_space<vmem>>, %arg3: memref<10x1xf32, #tpu.memory_space<vmem>>, %arg4: memref<10x10xf32, #tpu.memory_space<vmem>>, %arg5: memref<10x1xf32, #tpu.memory_space<vmem>>, %arg6: memref<1x10x144xf32, #tpu.memory_space<vmem>>, %arg7: memref<1x10x144xf32, #tpu.memory_space<vmem>>) attributes {dimension_semantics = [#tpu.dimension_semantics<parallel>], iteration_bounds = array<i64: 2>, scalar_prefetch = 0 : i64, scratch_operands = 0 : i64, tpu.core_type = #tpu.core_type<tc>, window_params = [{transform_indices = @transform_0, window_bounds = array<i64: 1, 20, 144>}, {pipeline_mode = #tpu.pipeline_mode<synchronous>, transform_indices = @transform_1, window_bounds = array<i64: 10, 20>}, {pipeline_mode = #tpu.pipeline_mode<synchronous>, transform_indices = @transform_2, window_bounds = array<i64: 10, 1>}, {pipeline_mode = #tpu.pipeline_mode<synchronous>, transform_indices = @transform_3, window_bounds = array<i64: 10, 10>}, {pipeline_mode = #tpu.pipeline_mode<synchronous>, transform_indices = @transform_4, window_bounds = array<i64: 10, 1>}, {transform_indices = @transform_5, window_bounds = array<i64: 1, 10, 144>}, {transform_indices = @transform_6, window_bounds = array<i64: 1, 10, 144>}]} {
    %c0 = arith.constant 0 : index
    %c0_0 = arith.constant 0 : index
    %0 = vector.load %arg2[%c0, %c0_0] : memref<10x20xf32, #tpu.memory_space<vmem>>, vector<10x20xf32>
    %c0_1 = arith.constant 0 : index
    %c0_2 = arith.constant 0 : index
    %c0_3 = arith.constant 0 : index
    %1 = vector.load %arg1[%c0_1, %c0_2, %c0_3] : memref<1x20x144xf32, #tpu.memory_space<vmem>>, vector<1x20x144xf32>
    %2 = vector.shape_cast %1 : vector<1x20x144xf32> to vector<20x144xf32>
    %cst = arith.constant dense<0.000000e+00> : vector<10x144xf32>
    %3 = tpu.matmul %0, %2, %cst {dimension_numbers = #tpu.dot_dimension_numbers<[1], [0], [0], [1], [0, 0, 1, 1], [], []>} : vector<10x20xf32>, vector<20x144xf32>, vector<10x144xf32> -> vector<10x144xf32>
    %c0_4 = arith.constant 0 : index
    %c0_5 = arith.constant 0 : index
    %4 = vector.load %arg3[%c0_4, %c0_5] : memref<10x1xf32, #tpu.memory_space<vmem>>, vector<10x1xf32>
    %5 = vector.broadcast %4 : vector<10x1xf32> to vector<10x144xf32>
    %6 = arith.addf %3, %5 : vector<10x144xf32>
    %cst_6 = arith.constant 0.000000e+00 : f32
    %7 = vector.broadcast %cst_6 : f32 to vector<10x144xf32>
    %8 = arith.maximumf %6, %7 : vector<10x144xf32>
    %c0_7 = arith.constant 0 : index
    %c0_8 = arith.constant 0 : index
    %c0_9 = arith.constant 0 : index
    %9 = vector.load %arg6[%c0_7, %c0_8, %c0_9] : memref<1x10x144xf32, #tpu.memory_space<vmem>>, vector<1x10x144xf32>
    %10 = vector.shape_cast %9 : vector<1x10x144xf32> to vector<10x144xf32>
    %11 = vector.shape_cast %8 : vector<10x144xf32> to vector<1x10x144xf32>
    tpu.vector_store %arg6[%c0_7, %c0_8, %c0_9], %11 {strides = array<i32>} : memref<1x10x144xf32, #tpu.memory_space<vmem>>, vector<1x10x144xf32>,
    %c0_10 = arith.constant 0 : index
    %c0_11 = arith.constant 0 : index
    %12 = vector.load %arg4[%c0_10, %c0_11] : memref<10x10xf32, #tpu.memory_space<vmem>>, vector<10x10xf32>
    %cst_12 = arith.constant dense<0.000000e+00> : vector<10x144xf32>
    %13 = tpu.matmul %12, %8, %cst_12 {dimension_numbers = #tpu.dot_dimension_numbers<[1], [0], [0], [1], [0, 0, 1, 1], [], []>} : vector<10x10xf32>, vector<10x144xf32>, vector<10x144xf32> -> vector<10x144xf32>
    %c0_13 = arith.constant 0 : index
    %c0_14 = arith.constant 0 : index
    %14 = vector.load %arg5[%c0_13, %c0_14] : memref<10x1xf32, #tpu.memory_space<vmem>>, vector<10x1xf32>
    %15 = vector.broadcast %14 : vector<10x1xf32> to vector<10x144xf32>
    %16 = arith.addf %13, %15 : vector<10x144xf32>
    %cst_15 = arith.constant 0.000000e+00 : f32
    %17 = vector.broadcast %cst_15 : f32 to vector<10x144xf32>
    %18 = arith.maximumf %16, %17 : vector<10x144xf32>
    %c0_16 = arith.constant 0 : index
    %c0_17 = arith.constant 0 : index
    %c0_18 = arith.constant 0 : index
    %19 = vector.load %arg7[%c0_16, %c0_17, %c0_18] : memref<1x10x144xf32, #tpu.memory_space<vmem>>, vector<1x10x144xf32>
    %20 = vector.shape_cast %19 : vector<1x10x144xf32> to vector<10x144xf32>
    %21 = vector.shape_cast %18 : vector<10x144xf32> to vector<1x10x144xf32>
    tpu.vector_store %arg7[%c0_16, %c0_17, %c0_18], %21 {strides = array<i32>} : memref<1x10x144xf32, #tpu.memory_space<vmem>>, vector<1x10x144xf32>,
    return
  }
  func.func @transform_0(%arg0: i32) -> (i32, i32, i32) {
    %c0_i32 = arith.constant 0 : i32
    %c0_i32_0 = arith.constant 0 : i32
    %c0_i32_1 = arith.constant 0 : i32
    return %arg0, %c0_i32, %c0_i32_0 : i32, i32, i32
  }
  func.func @transform_1(%arg0: i32) -> (i32, i32) {
    %c0_i32 = arith.constant 0 : i32
    %c0_i32_0 = arith.constant 0 : i32
    %c0_i32_1 = arith.constant 0 : i32
    return %c0_i32, %c0_i32_0 : i32, i32
  }
  func.func @transform_2(%arg0: i32) -> (i32, i32) {
    %c0_i32 = arith.constant 0 : i32
    %c0_i32_0 = arith.constant 0 : i32
    %c0_i32_1 = arith.constant 0 : i32
    return %c0_i32, %c0_i32_0 : i32, i32
  }
  func.func @transform_3(%arg0: i32) -> (i32, i32) {
    %c0_i32 = arith.constant 0 : i32
    %c0_i32_0 = arith.constant 0 : i32
    %c0_i32_1 = arith.constant 0 : i32
    return %c0_i32, %c0_i32_0 : i32, i32
  }
  func.func @transform_4(%arg0: i32) -> (i32, i32) {
    %c0_i32 = arith.constant 0 : i32
    %c0_i32_0 = arith.constant 0 : i32
    %c0_i32_1 = arith.constant 0 : i32
    return %c0_i32, %c0_i32_0 : i32, i32
  }
  func.func @transform_5(%arg0: i32) -> (i32, i32, i32) {
    %c0_i32 = arith.constant 0 : i32
    %c0_i32_0 = arith.constant 0 : i32
    %c0_i32_1 = arith.constant 0 : i32
    return %arg0, %c0_i32, %c0_i32_0 : i32, i32, i32
  }
  func.func @transform_6(%arg0: i32) -> (i32, i32, i32) {
    %c0_i32 = arith.constant 0 : i32
    %c0_i32_0 = arith.constant 0 : i32
    %c0_i32_1 = arith.constant 0 : i32
    return %arg0, %c0_i32, %c0_i32_0 : i32, i32, i32
  }
}

module attributes {stable_mosaic.version = 11 : i64} {
  func.func @_conv_kernel(%arg0: i32, %arg1: memref<1x40x25xf32, #tpu.memory_space<vmem>>, %arg2: memref<20x40xf32, #tpu.memory_space<vmem>>, %arg3: memref<20x1xf32, #tpu.memory_space<vmem>>, %arg4: memref<1x20x25xf32, #tpu.memory_space<vmem>>) attributes {dimension_semantics = [#tpu.dimension_semantics<parallel>], iteration_bounds = array<i64: 2>, scalar_prefetch = 0 : i64, scratch_operands = 0 : i64, tpu.core_type = #tpu.core_type<tc>, window_params = [{transform_indices = @transform_0, window_bounds = array<i64: 1, 40, 25>}, {pipeline_mode = #tpu.pipeline_mode<synchronous>, transform_indices = @transform_1, window_bounds = array<i64: 20, 40>}, {pipeline_mode = #tpu.pipeline_mode<synchronous>, transform_indices = @transform_2, window_bounds = array<i64: 20, 1>}, {transform_indices = @transform_3, window_bounds = array<i64: 1, 20, 25>}]} {
    %c0 = arith.constant 0 : index
    %c0_0 = arith.constant 0 : index
    %0 = vector.load %arg2[%c0, %c0_0] : memref<20x40xf32, #tpu.memory_space<vmem>>, vector<20x40xf32>
    %c0_1 = arith.constant 0 : index
    %c0_2 = arith.constant 0 : index
    %c0_3 = arith.constant 0 : index
    %1 = vector.load %arg1[%c0_1, %c0_2, %c0_3] : memref<1x40x25xf32, #tpu.memory_space<vmem>>, vector<1x40x25xf32>
    %2 = vector.shape_cast %1 : vector<1x40x25xf32> to vector<40x25xf32>
    %cst = arith.constant dense<0.000000e+00> : vector<20x25xf32>
    %3 = tpu.matmul %0, %2, %cst {dimension_numbers = #tpu.dot_dimension_numbers<[1], [0], [0], [1], [0, 0, 1, 1], [], []>} : vector<20x40xf32>, vector<40x25xf32>, vector<20x25xf32> -> vector<20x25xf32>
    %c0_4 = arith.constant 0 : index
    %c0_5 = arith.constant 0 : index
    %4 = vector.load %arg3[%c0_4, %c0_5] : memref<20x1xf32, #tpu.memory_space<vmem>>, vector<20x1xf32>
    %5 = vector.broadcast %4 : vector<20x1xf32> to vector<20x25xf32>
    %6 = arith.addf %3, %5 : vector<20x25xf32>
    %cst_6 = arith.constant 0.000000e+00 : f32
    %7 = vector.broadcast %cst_6 : f32 to vector<20x25xf32>
    %8 = arith.maximumf %6, %7 : vector<20x25xf32>
    %c0_7 = arith.constant 0 : index
    %c0_8 = arith.constant 0 : index
    %c0_9 = arith.constant 0 : index
    %9 = vector.load %arg4[%c0_7, %c0_8, %c0_9] : memref<1x20x25xf32, #tpu.memory_space<vmem>>, vector<1x20x25xf32>
    %10 = vector.shape_cast %9 : vector<1x20x25xf32> to vector<20x25xf32>
    %11 = vector.shape_cast %8 : vector<20x25xf32> to vector<1x20x25xf32>
    tpu.vector_store %arg4[%c0_7, %c0_8, %c0_9], %11 {strides = array<i32>} : memref<1x20x25xf32, #tpu.memory_space<vmem>>, vector<1x20x25xf32>,
    return
  }
  func.func @transform_0(%arg0: i32) -> (i32, i32, i32) {
    %c0_i32 = arith.constant 0 : i32
    %c0_i32_0 = arith.constant 0 : i32
    %c0_i32_1 = arith.constant 0 : i32
    return %arg0, %c0_i32, %c0_i32_0 : i32, i32, i32
  }
  func.func @transform_1(%arg0: i32) -> (i32, i32) {
    %c0_i32 = arith.constant 0 : i32
    %c0_i32_0 = arith.constant 0 : i32
    %c0_i32_1 = arith.constant 0 : i32
    return %c0_i32, %c0_i32_0 : i32, i32
  }
  func.func @transform_2(%arg0: i32) -> (i32, i32) {
    %c0_i32 = arith.constant 0 : i32
    %c0_i32_0 = arith.constant 0 : i32
    %c0_i32_1 = arith.constant 0 : i32
    return %c0_i32, %c0_i32_0 : i32, i32
  }
  func.func @transform_3(%arg0: i32) -> (i32, i32, i32) {
    %c0_i32 = arith.constant 0 : i32
    %c0_i32_0 = arith.constant 0 : i32
    %c0_i32_1 = arith.constant 0 : i32
    return %arg0, %c0_i32, %c0_i32_0 : i32, i32, i32
  }
}

module attributes {stable_mosaic.version = 11 : i64} {
  func.func @_conv_pair_kernel(%arg0: i32, %arg1: memref<1x80x16xf32, #tpu.memory_space<vmem>>, %arg2: memref<40x80xf32, #tpu.memory_space<vmem>>, %arg3: memref<40x1xf32, #tpu.memory_space<vmem>>, %arg4: memref<80x40xf32, #tpu.memory_space<vmem>>, %arg5: memref<80x1xf32, #tpu.memory_space<vmem>>, %arg6: memref<1x40x16xf32, #tpu.memory_space<vmem>>, %arg7: memref<1x80x16xf32, #tpu.memory_space<vmem>>) attributes {dimension_semantics = [#tpu.dimension_semantics<parallel>], iteration_bounds = array<i64: 2>, scalar_prefetch = 0 : i64, scratch_operands = 0 : i64, tpu.core_type = #tpu.core_type<tc>, window_params = [{transform_indices = @transform_0, window_bounds = array<i64: 1, 80, 16>}, {pipeline_mode = #tpu.pipeline_mode<synchronous>, transform_indices = @transform_1, window_bounds = array<i64: 40, 80>}, {pipeline_mode = #tpu.pipeline_mode<synchronous>, transform_indices = @transform_2, window_bounds = array<i64: 40, 1>}, {pipeline_mode = #tpu.pipeline_mode<synchronous>, transform_indices = @transform_3, window_bounds = array<i64: 80, 40>}, {pipeline_mode = #tpu.pipeline_mode<synchronous>, transform_indices = @transform_4, window_bounds = array<i64: 80, 1>}, {transform_indices = @transform_5, window_bounds = array<i64: 1, 40, 16>}, {transform_indices = @transform_6, window_bounds = array<i64: 1, 80, 16>}]} {
    %c0 = arith.constant 0 : index
    %c0_0 = arith.constant 0 : index
    %0 = vector.load %arg2[%c0, %c0_0] : memref<40x80xf32, #tpu.memory_space<vmem>>, vector<40x80xf32>
    %c0_1 = arith.constant 0 : index
    %c0_2 = arith.constant 0 : index
    %c0_3 = arith.constant 0 : index
    %1 = vector.load %arg1[%c0_1, %c0_2, %c0_3] : memref<1x80x16xf32, #tpu.memory_space<vmem>>, vector<1x80x16xf32>
    %2 = vector.shape_cast %1 : vector<1x80x16xf32> to vector<80x16xf32>
    %cst = arith.constant dense<0.000000e+00> : vector<40x16xf32>
    %3 = tpu.matmul %0, %2, %cst {dimension_numbers = #tpu.dot_dimension_numbers<[1], [0], [0], [1], [0, 0, 1, 1], [], []>} : vector<40x80xf32>, vector<80x16xf32>, vector<40x16xf32> -> vector<40x16xf32>
    %c0_4 = arith.constant 0 : index
    %c0_5 = arith.constant 0 : index
    %4 = vector.load %arg3[%c0_4, %c0_5] : memref<40x1xf32, #tpu.memory_space<vmem>>, vector<40x1xf32>
    %5 = vector.broadcast %4 : vector<40x1xf32> to vector<40x16xf32>
    %6 = arith.addf %3, %5 : vector<40x16xf32>
    %cst_6 = arith.constant 0.000000e+00 : f32
    %7 = vector.broadcast %cst_6 : f32 to vector<40x16xf32>
    %8 = arith.maximumf %6, %7 : vector<40x16xf32>
    %c0_7 = arith.constant 0 : index
    %c0_8 = arith.constant 0 : index
    %c0_9 = arith.constant 0 : index
    %9 = vector.load %arg6[%c0_7, %c0_8, %c0_9] : memref<1x40x16xf32, #tpu.memory_space<vmem>>, vector<1x40x16xf32>
    %10 = vector.shape_cast %9 : vector<1x40x16xf32> to vector<40x16xf32>
    %11 = vector.shape_cast %8 : vector<40x16xf32> to vector<1x40x16xf32>
    tpu.vector_store %arg6[%c0_7, %c0_8, %c0_9], %11 {strides = array<i32>} : memref<1x40x16xf32, #tpu.memory_space<vmem>>, vector<1x40x16xf32>,
    %c0_10 = arith.constant 0 : index
    %c0_11 = arith.constant 0 : index
    %12 = vector.load %arg4[%c0_10, %c0_11] : memref<80x40xf32, #tpu.memory_space<vmem>>, vector<80x40xf32>
    %cst_12 = arith.constant dense<0.000000e+00> : vector<80x16xf32>
    %13 = tpu.matmul %12, %8, %cst_12 {dimension_numbers = #tpu.dot_dimension_numbers<[1], [0], [0], [1], [0, 0, 1, 1], [], []>} : vector<80x40xf32>, vector<40x16xf32>, vector<80x16xf32> -> vector<80x16xf32>
    %c0_13 = arith.constant 0 : index
    %c0_14 = arith.constant 0 : index
    %14 = vector.load %arg5[%c0_13, %c0_14] : memref<80x1xf32, #tpu.memory_space<vmem>>, vector<80x1xf32>
    %15 = vector.broadcast %14 : vector<80x1xf32> to vector<80x16xf32>
    %16 = arith.addf %13, %15 : vector<80x16xf32>
    %cst_15 = arith.constant 0.000000e+00 : f32
    %17 = vector.broadcast %cst_15 : f32 to vector<80x16xf32>
    %18 = arith.maximumf %16, %17 : vector<80x16xf32>
    %c0_16 = arith.constant 0 : index
    %c0_17 = arith.constant 0 : index
    %c0_18 = arith.constant 0 : index
    %19 = vector.load %arg7[%c0_16, %c0_17, %c0_18] : memref<1x80x16xf32, #tpu.memory_space<vmem>>, vector<1x80x16xf32>
    %20 = vector.shape_cast %19 : vector<1x80x16xf32> to vector<80x16xf32>
    %21 = vector.shape_cast %18 : vector<80x16xf32> to vector<1x80x16xf32>
    tpu.vector_store %arg7[%c0_16, %c0_17, %c0_18], %21 {strides = array<i32>} : memref<1x80x16xf32, #tpu.memory_space<vmem>>, vector<1x80x16xf32>,
    return
  }
  func.func @transform_0(%arg0: i32) -> (i32, i32, i32) {
    %c0_i32 = arith.constant 0 : i32
    %c0_i32_0 = arith.constant 0 : i32
    %c0_i32_1 = arith.constant 0 : i32
    return %arg0, %c0_i32, %c0_i32_0 : i32, i32, i32
  }
  func.func @transform_1(%arg0: i32) -> (i32, i32) {
    %c0_i32 = arith.constant 0 : i32
    %c0_i32_0 = arith.constant 0 : i32
    %c0_i32_1 = arith.constant 0 : i32
    return %c0_i32, %c0_i32_0 : i32, i32
  }
  func.func @transform_2(%arg0: i32) -> (i32, i32) {
    %c0_i32 = arith.constant 0 : i32
    %c0_i32_0 = arith.constant 0 : i32
    %c0_i32_1 = arith.constant 0 : i32
    return %c0_i32, %c0_i32_0 : i32, i32
  }
  func.func @transform_3(%arg0: i32) -> (i32, i32) {
    %c0_i32 = arith.constant 0 : i32
    %c0_i32_0 = arith.constant 0 : i32
    %c0_i32_1 = arith.constant 0 : i32
    return %c0_i32, %c0_i32_0 : i32, i32
  }
  func.func @transform_4(%arg0: i32) -> (i32, i32) {
    %c0_i32 = arith.constant 0 : i32
    %c0_i32_0 = arith.constant 0 : i32
    %c0_i32_1 = arith.constant 0 : i32
    return %c0_i32, %c0_i32_0 : i32, i32
  }
  func.func @transform_5(%arg0: i32) -> (i32, i32, i32) {
    %c0_i32 = arith.constant 0 : i32
    %c0_i32_0 = arith.constant 0 : i32
    %c0_i32_1 = arith.constant 0 : i32
    return %arg0, %c0_i32, %c0_i32_0 : i32, i32, i32
  }
  func.func @transform_6(%arg0: i32) -> (i32, i32, i32) {
    %c0_i32 = arith.constant 0 : i32
    %c0_i32_0 = arith.constant 0 : i32
    %c0_i32_1 = arith.constant 0 : i32
    return %arg0, %c0_i32, %c0_i32_0 : i32, i32, i32
  }
}

module attributes {stable_mosaic.version = 11 : i64} {
  func.func @_fc_head_kernel(%arg0: memref<2x320xf32, #tpu.memory_space<vmem>>, %arg1: memref<320x160xf32, #tpu.memory_space<vmem>>, %arg2: memref<1x160xf32, #tpu.memory_space<vmem>>, %arg3: memref<160x50xf32, #tpu.memory_space<vmem>>, %arg4: memref<1x50xf32, #tpu.memory_space<vmem>>, %arg5: memref<50x10xf32, #tpu.memory_space<vmem>>, %arg6: memref<1x10xf32, #tpu.memory_space<vmem>>, %arg7: memref<2x160xf32, #tpu.memory_space<vmem>>, %arg8: memref<2x50xf32, #tpu.memory_space<vmem>>, %arg9: memref<2x10xf32, #tpu.memory_space<vmem>>, %arg10: memref<2x10xf32, #tpu.memory_space<vmem>>) attributes {dimension_semantics = [], scalar_prefetch = 0 : i64, scratch_operands = 0 : i64, tpu.core_type = #tpu.core_type<tc>} {
    %c0 = arith.constant 0 : index
    %c0_0 = arith.constant 0 : index
    %0 = vector.load %arg0[%c0, %c0_0] : memref<2x320xf32, #tpu.memory_space<vmem>>, vector<2x320xf32>
    %c0_1 = arith.constant 0 : index
    %c0_2 = arith.constant 0 : index
    %1 = vector.load %arg1[%c0_1, %c0_2] : memref<320x160xf32, #tpu.memory_space<vmem>>, vector<320x160xf32>
    %cst = arith.constant dense<0.000000e+00> : vector<2x160xf32>
    %2 = tpu.matmul %0, %1, %cst {dimension_numbers = #tpu.dot_dimension_numbers<[1], [0], [0], [1], [0, 0, 1, 1], [], []>} : vector<2x320xf32>, vector<320x160xf32>, vector<2x160xf32> -> vector<2x160xf32>
    %c0_3 = arith.constant 0 : index
    %c0_4 = arith.constant 0 : index
    %3 = vector.load %arg2[%c0_3, %c0_4] : memref<1x160xf32, #tpu.memory_space<vmem>>, vector<1x160xf32>
    %4 = vector.broadcast %3 : vector<1x160xf32> to vector<2x160xf32>
    %5 = arith.addf %2, %4 : vector<2x160xf32>
    %cst_5 = arith.constant 0.000000e+00 : f32
    %6 = vector.broadcast %cst_5 : f32 to vector<2x160xf32>
    %7 = arith.maximumf %5, %6 : vector<2x160xf32>
    %c0_6 = arith.constant 0 : index
    %c0_7 = arith.constant 0 : index
    %8 = vector.load %arg7[%c0_6, %c0_7] : memref<2x160xf32, #tpu.memory_space<vmem>>, vector<2x160xf32>
    tpu.vector_store %arg7[%c0_6, %c0_7], %7 {strides = array<i32>} : memref<2x160xf32, #tpu.memory_space<vmem>>, vector<2x160xf32>,
    %c0_8 = arith.constant 0 : index
    %c0_9 = arith.constant 0 : index
    %9 = vector.load %arg3[%c0_8, %c0_9] : memref<160x50xf32, #tpu.memory_space<vmem>>, vector<160x50xf32>
    %cst_10 = arith.constant dense<0.000000e+00> : vector<2x50xf32>
    %10 = tpu.matmul %7, %9, %cst_10 {dimension_numbers = #tpu.dot_dimension_numbers<[1], [0], [0], [1], [0, 0, 1, 1], [], []>} : vector<2x160xf32>, vector<160x50xf32>, vector<2x50xf32> -> vector<2x50xf32>
    %c0_11 = arith.constant 0 : index
    %c0_12 = arith.constant 0 : index
    %11 = vector.load %arg4[%c0_11, %c0_12] : memref<1x50xf32, #tpu.memory_space<vmem>>, vector<1x50xf32>
    %12 = vector.broadcast %11 : vector<1x50xf32> to vector<2x50xf32>
    %13 = arith.addf %10, %12 : vector<2x50xf32>
    %cst_13 = arith.constant 0.000000e+00 : f32
    %14 = vector.broadcast %cst_13 : f32 to vector<2x50xf32>
    %15 = arith.maximumf %13, %14 : vector<2x50xf32>
    %c0_14 = arith.constant 0 : index
    %c0_15 = arith.constant 0 : index
    %16 = vector.load %arg8[%c0_14, %c0_15] : memref<2x50xf32, #tpu.memory_space<vmem>>, vector<2x50xf32>
    tpu.vector_store %arg8[%c0_14, %c0_15], %15 {strides = array<i32>} : memref<2x50xf32, #tpu.memory_space<vmem>>, vector<2x50xf32>,
    %c0_16 = arith.constant 0 : index
    %c0_17 = arith.constant 0 : index
    %17 = vector.load %arg5[%c0_16, %c0_17] : memref<50x10xf32, #tpu.memory_space<vmem>>, vector<50x10xf32>
    %cst_18 = arith.constant dense<0.000000e+00> : vector<2x10xf32>
    %18 = tpu.matmul %15, %17, %cst_18 {dimension_numbers = #tpu.dot_dimension_numbers<[1], [0], [0], [1], [0, 0, 1, 1], [], []>} : vector<2x50xf32>, vector<50x10xf32>, vector<2x10xf32> -> vector<2x10xf32>
    %c0_19 = arith.constant 0 : index
    %c0_20 = arith.constant 0 : index
    %19 = vector.load %arg6[%c0_19, %c0_20] : memref<1x10xf32, #tpu.memory_space<vmem>>, vector<1x10xf32>
    %20 = vector.broadcast %19 : vector<1x10xf32> to vector<2x10xf32>
    %21 = arith.addf %18, %20 : vector<2x10xf32>
    %c0_21 = arith.constant 0 : index
    %c0_22 = arith.constant 0 : index
    %22 = vector.load %arg9[%c0_21, %c0_22] : memref<2x10xf32, #tpu.memory_space<vmem>>, vector<2x10xf32>
    tpu.vector_store %arg9[%c0_21, %c0_22], %21 {strides = array<i32>} : memref<2x10xf32, #tpu.memory_space<vmem>>, vector<2x10xf32>,
    %cst_23 = arith.constant dense<0xFF800000> : vector<2xf32>
    %23 = vector.multi_reduction <maximumf>, %21, %cst_23 [1] : vector<2x10xf32> to vector<2xf32>
    %24 = vector.shape_cast %23 : vector<2xf32> to vector<2x1xf32>
    %25 = vector.broadcast %24 : vector<2x1xf32> to vector<2x10xf32>
    %26 = arith.subf %21, %25 : vector<2x10xf32>
    %27 = math.exp %26 : vector<2x10xf32>
    %cst_24 = arith.constant dense<0.000000e+00> : vector<2xf32>
    %28 = vector.multi_reduction <add>, %27, %cst_24 [1] : vector<2x10xf32> to vector<2xf32>
    %29 = vector.shape_cast %28 : vector<2xf32> to vector<2x1xf32>
    %30 = math.log %29 : vector<2x1xf32>
    %31 = vector.broadcast %30 : vector<2x1xf32> to vector<2x10xf32>
    %32 = arith.subf %26, %31 : vector<2x10xf32>
    %c0_25 = arith.constant 0 : index
    %c0_26 = arith.constant 0 : index
    %33 = vector.load %arg10[%c0_25, %c0_26] : memref<2x10xf32, #tpu.memory_space<vmem>>, vector<2x10xf32>
    tpu.vector_store %arg10[%c0_25, %c0_26], %32 {strides = array<i32>} : memref<2x10xf32, #tpu.memory_space<vmem>>, vector<2x10xf32>,
    return
  }
}

</mosaic_0001>

<bundles_post_ra>
// kernel: net10_forward.5
= control target key start
LH: loop header
LB: loop body
LE: loop exit
PB: predicated region body
PF: predicated region fallthrough
CT: control target
= control target key end

     0   :  { %s779_s21 = smov 0   ;;  %s853_s0 = inlined_call_operand.vmem [shape: f32[2,4,729], index: 0, kind: input, shape index: {}]   ;;  %s854_s1 = inlined_call_operand.vmem [shape: f32[5,4], index: 1, kind: input, shape index: {}]   ;;  %s855_s2 = inlined_call_operand.vmem [shape: f32[5,1], index: 2, kind: input, shape index: {}]   ;;  %s856_s3 = inlined_call_operand.vmem [shape: f32[5,5], index: 3, kind: input, shape index: {}]   ;;  %s857_s4 = inlined_call_operand.vmem [shape: f32[5,1], index: 4, kind: input, shape index: {}]   ;;  %s858_s5 = inlined_call_operand.vmem [shape: f32[2,5,729], index: 5, kind: output, shape index: {0}]   ;;  %s859_s6 = inlined_call_operand.vmem [shape: f32[2,5,729], index: 6, kind: output, shape index: {1}]  }
   0x1 LB: > { %s689_s22 = sadd.s32 4294967295, %s741_s21   ;;  %p693_p0 = scmp.ge.s32.totalorder %s741_s21, 1  ;;  %s741_s21 = sphi %s779_s21, %s17_s21  }
   0x2   : > { %p215_p1 = scmp.lt.s32.totalorder %s741_s21, 3 }
   0x4   : > { %p216_p2 = pnand %p693_p0, %p215_p1 }
   0x5   : > { %p250_p3 = scmp.lt.s32.totalorder (!%p216_p2), %s689_s22, 1 }
   0x6   : > { %219 = sbr.rel (%p216_p2) target bundleno = 304 (0x130), region = 40 }
   0xb   : > { %v743_v0 = vmov 0   ;;  %v269_v1 = vld [vmem:[%s855_s2] sm:$0x1f]  ;;  %s861_s22 = smov (!%p250_p3, %s689_s22), 1  ;;  %vm293_vm0 = vcmask 1043456   ;;  %vm289_vm1 = vcmask 31744  }
   0xc   : > { %734 = vset.pattern.permute.xlu0 %v743_v0  ;;  %s723_s25 = smul.u32 24, %s861_s22  ;;  %v440_v2 = vld [vmem:[%s857_s4] sm:$0x1f]  ;;  %vm450_vm2 = vcmask 1044480   ;;  %vm446_vm3 = vcmask 39936   ;;  %vm437_vm4 = vcmask 724992  }
   0xd   : > { %272 = vperm.xlu0 %734, %v269_v1   ;;  %v265_v6 = vld [vmem:[%s854_s1] sm:$0x1f]  ;;  %s724_s9 = smul.u32 48, %s861_s22 }
   0xe   : > { %s254_s28 = scalar_lea.vmem %s853_s0, %s723_s25  ;;  %v439_v20 = vld [vmem:[%s856_s3] sm:$0x1f] }
   0xf   : > { %v266_v3 = vld [vmem:[%s254_s28] sm:$0xff]  ;;  %v267_v4 = vld [vmem:[%s254_s28 + $0x8] sm:$0xff]  ;;  %v268_v5 = vld [vmem:[%s254_s28 + $0x10] sm:$0xff]  ;;  %s820_s12 = scalar_lea.vmem %s858_s5, %s724_s9  ;;  %s264_s17 = scalar_lea.vmem %s859_s6, %s724_s9 }
  0x10   : > { %278 = vst [vmem:[#allocation1] ss:$2 sm:$0xff] %v266_v3 }
  0x11   : > { %280 = vst [vmem:[#allocation1 + $0x10] ss:$2 sm:$0xff] %v267_v4 }
  0x12   : > { %282 = vst [vmem:[#allocation1 + $0x20] ss:$2 sm:$0xff] %v268_v5 }
  0x15   : > { %443 = vperm.xlu0 %734, %v440_v2  }
  0x17   : > { %v283_v7 = vld.sshfl [vmem:[#allocation1] sm:$0xff pattern:$0x75316420]  ;;  %v284_v8 = vld.sshfl [vmem:[#allocation1 + $0x8] sm:$0xff pattern:$0x75316420] }
  0x18   : > { %697 = vmatpush.msk.msra.mxu0 %vm293_vm0, %v283_v7  ;;  %699 = vmatpush.msk.msra.mxu1 %vm293_vm0, %v284_v8  ;;  %v285_v9 = vld.sshfl [vmem:[#allocation1 + $0x10] sm:$0xff pattern:$0x75316420]  ;;  %v286_v10 = vld.sshfl [vmem:[#allocation1 + $0x18] sm:$0xff pattern:$0x75316420] }
  0x19   : > { %701 = vmatpush.msk.msra.mxu2 %vm293_vm0, %v285_v9  ;;  %703 = vmatpush.msk.msra.mxu3 %vm293_vm0, %v286_v10  ;;  %v287_v11 = vld.sshfl [vmem:[#allocation1 + $0x20] sm:$0xff pattern:$0x75316420]  ;;  %v288_v12 = vld.sshfl [vmem:[#allocation1 + $0x28] sm:$0xff pattern:$0x75316420] }
  0x1a   : > { %698 = vmatmul.msk.f32.vlgmr.msra.gmra.mxu0 %vm289_vm1, %v265_v6  ;;  %700 = vmatmul.msk.f32.vlgmr.msra.gmra.mxu1 %vm289_vm1, %v265_v6 }
  0x1b   : > { %702 = vmatmul.msk.f32.vlgmr.msra.gmra.mxu2 %vm289_vm1, %v265_v6  ;;  %704 = vmatmul.msk.f32.vlgmr.msra.gmra.mxu3 %vm289_vm1, %v265_v6 }
  0x1c   : > { %705 = vmatpush.msk.msrb.mxu0 %vm293_vm0, %v287_v11  ;;  %707 = vmatpush.msk.msrb.mxu1 %vm293_vm0, %v288_v12 }
  0x22   : > { %706 = vmatmul.msk.f32.vlgmr.msrb.gmra.mxu0 %vm289_vm1, %v265_v6  ;;  %708 = vmatmul.msk.f32.vlgmr.msrb.gmra.mxu1 %vm289_vm1, %v265_v6 }
  0x7f   : > { %v273_v13 = vpop.permute.xlu0 %272 }
  0x87   : > { %v444_v33 = vpop.permute.xlu0 %443 }
  0x97   : > { %v323_v14 = vpop.f32.mrf.mxu0  ;;  %v343_v15 = vpop.f32.mrf.mxu1 }
  0x98   : > { %v324_v16 = vadd.f32 %v323_v14, %v273_v13  ;;  %v344_v17 = vadd.f32 %v343_v15, %v273_v13 }
  0x9a   : > { %v426_v18 = vmax.f32 %v324_v16, 0.0  ;;  %v427_v19 = vmax.f32 %v344_v17, 0.0 }
  0x9c   : > { %432 = vst [vmem:[%s820_s12] sm:$0x1f] %v426_v18  ;;  %709 = vmatpush.msk.msrb.mxu2 %vm450_vm2, %v426_v18  ;;  %711 = vmatpush.msk.msrb.mxu3 %vm450_vm2, %v427_v19 }
  0x9d   : > { %433 = vst [vmem:[%s820_s12 + $0x8] sm:$0x1f] %v427_v19  ;;  %710 = vmatmul.msk.f32.vlgmr.msrb.gmra.mxu2 %vm446_vm3, %v439_v20  ;;  %712 = vmatmul.msk.f32.vlgmr.msrb.gmra.mxu3 %vm446_vm3, %v439_v20 }
  0x9e   : > { %v363_v21 = vpop.f32.mrf.mxu2  ;;  %v383_v22 = vpop.f32.mrf.mxu3 }
  0x9f   : > { %v364_v23 = vadd.f32 %v363_v21, %v273_v13  ;;  %v384_v24 = vadd.f32 %v383_v22, %v273_v13  ;;  %v403_v25 = vpop.f32.mrf.mxu0  ;;  %v423_v26 = vpop.f32.mrf.mxu1 }
  0xa0   : > { %v404_v27 = vadd.f32 %v403_v25, %v273_v13  ;;  %v424_v28 = vadd.f32 %v423_v26, %v273_v13 }
  0xa1   : > { %v428_v29 = vmax.f32 %v364_v23, 0.0  ;;  %v429_v30 = vmax.f32 %v384_v24, 0.0 }
  0xa2   : > { %v430_v31 = vmax.f32 %v404_v27, 0.0  ;;  %v431_v32 = vmax.f32 %v424_v28, 0.0 }
  0xa3   : > { %434 = vst [vmem:[%s820_s12 + $0x10] sm:$0x1f] %v428_v29  ;;  %713 = vmatpush.msk.msra.mxu0 %vm450_vm2, %v428_v29  ;;  %715 = vmatpush.msk.msra.mxu1 %vm450_vm2, %v429_v30 }
  0xa4   : > { %435 = vst [vmem:[%s820_s12 + $0x18] sm:$0x1f] %v429_v30  ;;  %714 = vmatmul.msk.f32.vlgmr.msra.gmra.mxu0 %vm446_vm3, %v439_v20  ;;  %716 = vmatmul.msk.f32.vlgmr.msra.gmra.mxu1 %vm446_vm3, %v439_v20 }
  0xa5   : > { %436 = vst [vmem:[%s820_s12 + $0x20] sm:$0x1f] %v430_v31  ;;  %717 = vmatpush.msk.msra.mxu2 %vm450_vm2, %v430_v31  ;;  %719 = vmatpush.msk.msra.mxu3 %vm450_vm2, %v431_v32 }
  0xa6   : > { %438 = vst.msk [vmem:[%s820_s12 + $0x28] sm:$0x1f] %vm437_vm4, %v431_v32  ;;  %718 = vmatmul.msk.f32.vlgmr.msra.gmra.mxu2 %vm446_vm3, %v439_v20  ;;  %720 = vmatmul.msk.f32.vlgmr.msra.gmra.mxu3 %vm446_vm3, %v439_v20 }
 0x120   : > { %v486_v34 = vpop.f32.mrf.mxu2  ;;  %v506_v35 = vpop.f32.mrf.mxu3 }
 0x121   : > { %v487_v36 = vadd.f32 %v486_v34, %v444_v33  ;;  %v507_v37 = vadd.f32 %v506_v35, %v444_v33  ;;  %v526_v38 = vpop.f32.mrf.mxu0  ;;  %v546_v39 = vpop.f32.mrf.mxu1 }
 0x122   : > { %v527_v40 = vadd.f32 %v526_v38, %v444_v33  ;;  %v547_v41 = vadd.f32 %v546_v39, %v444_v33 }
 0x123   : > { %v589_v42 = vmax.f32 %v487_v36, 0.0  ;;  %v590_v43 = vmax.f32 %v507_v37, 0.0 }
 0x124   : > { %v591_v44 = vmax.f32 %v527_v40, 0.0  ;;  %v592_v45 = vmax.f32 %v547_v41, 0.0 }
 0x125   : > { %595 = vst [vmem:[%s264_s17] sm:$0x1f] %v589_v42 }
 0x126   : > { %596 = vst [vmem:[%s264_s17 + $0x8] sm:$0x1f] %v590_v43 }
 0x127   : > { %597 = vst [vmem:[%s264_s17 + $0x10] sm:$0x1f] %v591_v44 }
 0x128   : > { %598 = vst [vmem:[%s264_s17 + $0x18] sm:$0x1f] %v592_v45 }
 0x129   : > { %v566_v46 = vpop.f32.mrf.mxu2  ;;  %v586_v47 = vpop.f32.mrf.mxu3 }
 0x12a   : > { %v567_v48 = vadd.f32 %v566_v46, %v444_v33  ;;  %v587_v49 = vadd.f32 %v586_v47, %v444_v33 }
 0x12c   : > { %v593_v50 = vmax.f32 %v567_v48, 0.0  ;;  %v594_v51 = vmax.f32 %v587_v49, 0.0 }
 0x12e   : > { %599 = vst [vmem:[%s264_s17 + $0x20] sm:$0x1f] %v593_v50 }
 0x12f   : > { %600 = vst.msk [vmem:[%s264_s17 + $0x28] sm:$0x1f] %vm437_vm4, %v594_v51 }
 0x130 PF: > { %s17_s21 = sadd.s32 1, %s741_s21  }
 0x131   : > { %p14_p4 = scmp.ge.s32.totalorder %s17_s21, 4  }
 0x133   :  { %16 = sbr.rel (!%p14_p4) target bundleno = 1 (0x1), region = 84 }

// kernel: net10_forward.6
= control target key start
LH: loop header
LB: loop body
LE: loop exit
PB: predicated region body
PF: predicated region fallthrough
CT: control target
= control target key end

     0   :  { %s607_s21 = smov 0   ;;  %s663_s0 = inlined_call_operand.vmem [shape: f32[2,20,144], index: 0, kind: input, shape index: {}]   ;;  %s664_s1 = inlined_call_operand.vmem [shape: f32[10,20], index: 1, kind: input, shape index: {}]   ;;  %s665_s2 = inlined_call_operand.vmem [shape: f32[10,1], index: 2, kind: input, shape index: {}]   ;;  %s666_s3 = inlined_call_operand.vmem [shape: f32[10,10], index: 3, kind: input, shape index: {}]   ;;  %s667_s4 = inlined_call_operand.vmem [shape: f32[10,1], index: 4, kind: input, shape index: {}]   ;;  %s668_s5 = inlined_call_operand.vmem [shape: f32[2,10,144], index: 5, kind: output, shape index: {0}]   ;;  %s669_s6 = inlined_call_operand.vmem [shape: f32[2,10,144], index: 6, kind: output, shape index: {1}]  }
   0x1 LB: > { %s525_s22 = sadd.s32 4294967295, %s569_s21   ;;  %p529_p0 = scmp.ge.s32.totalorder %s569_s21, 1  ;;  %s569_s21 = sphi %s607_s21, %s17_s21  }
   0x2   : > { %p215_p1 = scmp.lt.s32.totalorder %s569_s21, 3 }
   0x4   : > { %p216_p2 = pnand %p529_p0, %p215_p1 }
   0x5   : > { %p250_p3 = scmp.lt.s32.totalorder (!%p216_p2), %s525_s22, 1 }
   0x6   : > { %219 = sbr.rel (%p216_p2) target bundleno = 308 (0x134), region = 40 }
   0xb   : > { %v571_v0 = vmov 0   ;;  %v274_v1 = vld [vmem:[%s665_s2 + $0x8] sm:$0x3]  ;;  %s671_s22 = smov (!%p250_p3, %s525_s22), 1  ;;  %vm292_vm0 = vcmask 1043456   ;;  %v273_v6 = vld [vmem:[%s665_s2] sm:$0xff] }
   0xc   : > { %561 = vset.pattern.permute.xlu0 %v571_v0  ;;  %562 = vset.pattern.permute.xlu1 %v571_v0  ;;  %s551_s25 = smul.u32 48, %s671_s22  ;;  %v265_v9 = vld [vmem:[%s664_s1] sm:$0xff]  ;;  %vm285_vm1 = vcmask 162816   ;;  %v266_v10 = vld [vmem:[%s664_s1 + $0x8] sm:$0x3]  ;;  %s549_s15 = sshll.u32 %s671_s22, 5 }
   0xd   : > { %282 = vperm.xlu0 %561, %v274_v1   ;;  %v357_v12 = vld [vmem:[%s667_s4] sm:$0xff]  ;;  %v358_v14 = vld [vmem:[%s667_s4 + $0x8] sm:$0x3]  ;;  %s259_s18 = scalar_lea.vmem %s668_s5, %s549_s15  ;;  %vm350_vm2 = vcmask 130048   ;;  %vm376_vm3 = vcmask 1041408   ;;  %vm353_vm4 = vcmask 123904   ;;  %s264_s27 = scalar_lea.vmem %s669_s6, %s549_s15 }
   0xe   : > { %s254_s28 = scalar_lea.vmem %s663_s0, %s551_s25  ;;  %361 = vperm.xlu1 %562, %v357_v12   ;;  %v355_v27 = vld [vmem:[%s666_s3] sm:$0xff]  ;;  %vm369_vm5 = vcmask 80896   ;;  %v356_v28 = vld [vmem:[%s666_s3 + $0x8] sm:$0x3] }
   0xf   : > { %v271_v2 = vld [vmem:[%s254_s28 + $0x20] sm:$0xf]  ;;  %v272_v3 = vld [vmem:[%s254_s28 + $0x28] sm:$0xf]  ;;  %v269_v4 = vld [vmem:[%s254_s28 + $0x10] sm:$0xff] }
  0x10   : > { %535 = vmatpush.msk.msra.mxu0 %vm292_vm0, %v271_v2  ;;  %538 = vmatpush.msk.msra.mxu1 %vm292_vm0, %v272_v3  ;;  %v270_v5 = vld [vmem:[%s254_s28 + $0x18] sm:$0xff]  ;;  %v267_v7 = vld [vmem:[%s254_s28] sm:$0xff]  ;;  %v268_v8 = vld [vmem:[%s254_s28 + $0x8] sm:$0xff] }
  0x12   : > { %313 = vmatpush.msra.mxu0 %v269_v4  ;;  %336 = vmatpush.msra.mxu1 %v270_v5 }
  0x14   : > { %314 = vmatpush.msra.mxu0 %v267_v7  ;;  %337 = vmatpush.msra.mxu1 %v268_v8 }
  0x15   : > { %277 = vperm.xlu0 %561, %v273_v6   ;;  %536 = vmatmul.msk.f32.vlgmr.msra.gmra.mxu0 %vm285_vm1, %v265_v9 }
  0x16   : > { %539 = vmatmul.msk.f32.vlgmr.msra.gmra.mxu1 %vm285_vm1, %v265_v9  ;;  %366 = vperm.xlu1 %562, %v358_v14  }
  0x1d   : > { %537 = vmatmul.msk.f32.gmra.mxu0 %vm285_vm1, %v266_v10 }
  0x1e   : > { %540 = vmatmul.msk.f32.gmra.mxu1 %vm285_vm1, %v266_v10 }
  0x7f   : > { %v283_v11 = vpop.permute.xlu0 %282 }
  0x80   : > { %v362_v29 = vpop.permute.xlu1 %361 }
  0x87   : > { %v278_v13 = vpop.permute.xlu0 %277 }
  0x88   : > { %v367_v36 = vpop.permute.xlu1 %366 }
  0x92   : > { %v316_v15 = vpop.f32.mrf.mxu0 }
  0x93   : > { %v339_v16 = vpop.f32.mrf.mxu1  ;;  %v317_v17 = vadd.f32 %v316_v15, %v278_v13 }
  0x94   : > { %v340_v18 = vadd.f32 %v339_v16, %v278_v13 }
  0x95   : > { %v345_v19 = vmax.f32 %v317_v17, 0.0 }
  0x96   : > { %v346_v20 = vmax.f32 %v340_v18, 0.0 }
  0x97   : > { %349 = vst [vmem:[%s259_s18] sm:$0xff] %v345_v19 }
  0x98   : > { %351 = vst.msk [vmem:[%s259_s18 + $0x8] sm:$0xff] %vm350_vm2, %v346_v20 }
  0x9a   : > { %v319_v21 = vpop.f32.mrf.mxu0 }
  0x9b   : > { %v342_v22 = vpop.f32.mrf.mxu1  ;;  %v320_v23 = vadd.f32 %v319_v21, %v283_v11 }
  0x9c   : > { %v343_v24 = vadd.f32 %v342_v22, %v283_v11 }
  0x9d   : > { %v347_v25 = vmax.f32 %v320_v23, 0.0 }
  0x9e   : > { %v348_v26 = vmax.f32 %v343_v24, 0.0 }
  0x9f   : > { %352 = vst [vmem:[%s259_s18 + $0x10] sm:$0x3] %v347_v25  ;;  %541 = vmatpush.msk.msra.mxu2 %vm376_vm3, %v347_v25 }
  0xa0   : > { %544 = vmatpush.msk.msra.mxu3 %vm376_vm3, %v348_v26  ;;  %354 = vst.msk [vmem:[%s259_s18 + $0x18] sm:$0x3] %vm353_vm4, %v348_v26 }
  0xa1   : > { %398 = vmatpush.msra.mxu2 %v345_v19 }
  0xa2   : > { %421 = vmatpush.msra.mxu3 %v346_v20  ;;  %542 = vmatmul.msk.f32.vlgmr.msra.gmra.mxu2 %vm369_vm5, %v355_v27 }
  0xa3   : > { %545 = vmatmul.msk.f32.vlgmr.msra.gmra.mxu3 %vm369_vm5, %v355_v27 }
  0xaa   : > { %543 = vmatmul.msk.f32.gmra.mxu2 %vm369_vm5, %v356_v28 }
  0xab   : > { %546 = vmatmul.msk.f32.gmra.mxu3 %vm369_vm5, %v356_v28 }
 0x125   : > { %v400_v30 = vpop.f32.mrf.mxu2 }
 0x126   : > { %v423_v31 = vpop.f32.mrf.mxu3  ;;  %v401_v32 = vadd.f32 %v400_v30, %v362_v29 }
 0x127   : > { %v424_v33 = vadd.f32 %v423_v31, %v362_v29 }
 0x128   : > { %v429_v34 = vmax.f32 %v401_v32, 0.0 }
 0x129   : > { %v430_v35 = vmax.f32 %v424_v33, 0.0 }
 0x12a   : > { %433 = vst [vmem:[%s264_s27] sm:$0xff] %v429_v34 }
 0x12b   : > { %434 = vst.msk [vmem:[%s264_s27 + $0x8] sm:$0xff] %vm350_vm2, %v430_v35 }
 0x12d   : > { %v403_v37 = vpop.f32.mrf.mxu2 }
 0x12e   : > { %v426_v38 = vpop.f32.mrf.mxu3  ;;  %v404_v39 = vadd.f32 %v403_v37, %v367_v36 }
 0x12f   : > { %v427_v40 = vadd.f32 %v426_v38, %v367_v36 }
 0x130   : > { %v431_v41 = vmax.f32 %v404_v39, 0.0 }
 0x131   : > { %v432_v42 = vmax.f32 %v427_v40, 0.0 }
 0x132   : > { %435 = vst [vmem:[%s264_s27 + $0x10] sm:$0x3] %v431_v41 }
 0x133   : > { %436 = vst.msk [vmem:[%s264_s27 + $0x18] sm:$0x3] %vm353_vm4, %v432_v42 }
 0x134 PF: > { %s17_s21 = sadd.s32 1, %s569_s21  }
 0x135   : > { %p14_p4 = scmp.ge.s32.totalorder %s17_s21, 4  }
 0x137   :  { %16 = sbr.rel (!%p14_p4) target bundleno = 1 (0x1), region = 82 }

// kernel: net10_forward.7
= control target key start
LH: loop header
LB: loop body
LE: loop exit
PB: predicated region body
PF: predicated region fallthrough
CT: control target
= control target key end

     0   :  { %s360_s12 = smov 0   ;;  %s399_s0 = inlined_call_operand.vmem [shape: f32[2,40,25], index: 0, kind: input, shape index: {}]   ;;  %s400_s1 = inlined_call_operand.vmem [shape: f32[20,40], index: 1, kind: input, shape index: {}]   ;;  %s401_s2 = inlined_call_operand.vmem [shape: f32[20,1], index: 2, kind: input, shape index: {}]   ;;  %s402_s3 = inlined_call_operand.vmem [shape: f32[2,20,25], index: 3, kind: output, shape index: {}]  }
   0x1 LB: > { %s296_s13 = sadd.s32 4294967295, %s337_s12   ;;  %p300_p0 = scmp.ge.s32.totalorder %s337_s12, 1  ;;  %s337_s12 = sphi %s360_s12, %s13_s12  }
   0x2   : > { %p137_p1 = scmp.lt.s32.totalorder %s337_s12, 3 }
   0x4   : > { %p138_p2 = pnand %p300_p0, %p137_p1 }
   0x5   : > { %p161_p3 = scmp.lt.s32.totalorder (!%p138_p2), %s296_s13, 1 }
   0x6   : > { %141 = sbr.rel (%p138_p2) target bundleno = 163 (0xa3), region = 32 }
   0xb   : > { %v179_v0 = vld [vmem:[%s401_s2] sm:$0xff]  ;;  %v339_v1 = vmov 0   ;;  %v181_v2 = vld [vmem:[%s401_s2 + $0x10] sm:$0xf]  ;;  %s404_s13 = smov (!%p161_p3, %s296_s13), 1  ;;  %v180_v5 = vld [vmem:[%s401_s2 + $0x8] sm:$0xff] }
   0xc   : > { %329 = vset.pattern.permute.xlu0 %v339_v1  ;;  %330 = vset.pattern.permute.xlu1 %v339_v1  ;;  %s318_s18 = smul.u32 40, %s404_s13  ;;  %v171_v9 = vld [vmem:[%s400_s1] sm:$0xff]  ;;  %vm197_vm0 = vcmask 326656   ;;  %v172_v10 = vld [vmem:[%s400_s1 + $0x8] sm:$0xff]  ;;  %v173_v11 = vld [vmem:[%s400_s1 + $0x10] sm:$0xf] }
   0xd   : > { %184 = vperm.xlu0 %329, %v179_v0   ;;  %194 = vperm.xlu1 %330, %v181_v2   ;;  %s319_s30 = smul.u32 24, %s404_s13  ;;  %vm236_vm1 = vcmask 203776   ;;  %vm239_vm2 = vcmask 199680  }
   0xe   : > { %s165_s21 = scalar_lea.vmem %s399_s0, %s318_s18 }
   0xf   : > { %v178_v3 = vld [vmem:[%s165_s21 + $0x20] sm:$0xff]  ;;  %v177_v4 = vld [vmem:[%s165_s21 + $0x18] sm:$0xff]  ;;  %v176_v6 = vld [vmem:[%s165_s21 + $0x10] sm:$0xff]  ;;  %s170_s6 = scalar_lea.vmem %s402_s3, %s319_s30 }
  0x10   : > { %218 = vmatpush.msra.mxu0 %v178_v3  ;;  %308 = vmatpush.msra.mxu1 %v178_v3  ;;  %v175_v7 = vld [vmem:[%s165_s21 + $0x8] sm:$0xff]  ;;  %v174_v8 = vld [vmem:[%s165_s21] sm:$0xff] }
  0x11   : > { %309 = vmatpush.msra.mxu2 %v178_v3 }
  0x12   : > { %219 = vmatpush.msra.mxu0 %v177_v4  ;;  %310 = vmatpush.msra.mxu1 %v177_v4 }
  0x13   : > { %311 = vmatpush.msra.mxu2 %v177_v4 }
  0x14   : > { %220 = vmatpush.msra.mxu0 %v176_v6  ;;  %312 = vmatpush.msra.mxu1 %v176_v6 }
  0x15   : > { %189 = vperm.xlu0 %329, %v180_v5   ;;  %313 = vmatpush.msra.mxu2 %v176_v6 }
  0x16   : > { %221 = vmatpush.msra.mxu0 %v175_v7  ;;  %314 = vmatpush.msra.mxu1 %v175_v7 }
  0x17   : > { %315 = vmatpush.msra.mxu2 %v175_v7 }
  0x18   : > { %222 = vmatpush.msra.mxu0 %v174_v8  ;;  %316 = vmatpush.msra.mxu1 %v174_v8 }
  0x19   : > { %317 = vmatpush.msra.mxu2 %v174_v8  ;;  %303 = vmatmul.msk.f32.vlgmr.msra.gmra.mxu0 %vm197_vm0, %v171_v9 }
  0x1a   : > { %304 = vmatmul.msk.f32.vlgmr.msra.gmra.mxu1 %vm197_vm0, %v172_v10  ;;  %305 = vmatmul.msk.f32.vlgmr.msra.gmra.mxu2 %vm197_vm0, %v173_v11 }
  0x7f   : > { %v185_v12 = vpop.permute.xlu0 %184  ;;  %v195_v20 = vpop.permute.xlu1 %194 }
  0x87   : > { %v190_v14 = vpop.permute.xlu0 %189 }
  0x96   : > { %v224_v13 = vpop.f32.mrf.mxu0 }
  0x97   : > { %v225_v15 = vadd.f32 %v224_v13, %v185_v12  ;;  %v227_v16 = vpop.f32.mrf.mxu1 }
  0x98   : > { %v228_v17 = vadd.f32 %v227_v16, %v190_v14 }
  0x99   : > { %v233_v18 = vmax.f32 %v225_v15, 0.0 }
  0x9a   : > { %v234_v19 = vmax.f32 %v228_v17, 0.0 }
  0x9b   : > { %237 = vst.msk [vmem:[%s170_s6] sm:$0xff] %vm236_vm1, %v233_v18 }
  0x9c   : > { %238 = vst.msk [vmem:[%s170_s6 + $0x8] sm:$0xff] %vm236_vm1, %v234_v19 }
  0x9d   : > { %v230_v21 = vpop.f32.mrf.mxu2 }
  0x9e   : > { %v231_v22 = vadd.f32 %v230_v21, %v195_v20 }
  0xa0   : > { %v235_v23 = vmax.f32 %v231_v22, 0.0 }
  0xa2   : > { %240 = vst.msk [vmem:[%s170_s6 + $0x10] sm:$0xf] %vm239_vm2, %v235_v23 }
  0xa3 PF: > { %s13_s12 = sadd.s32 1, %s337_s12  }
  0xa4   : > { %p10_p4 = scmp.ge.s32.totalorder %s13_s12, 4  }
  0xa6   :  { %12 = sbr.rel (!%p10_p4) target bundleno = 1 (0x1), region = 62 }

// kernel: net10_forward.8
= control target key start
LH: loop header
LB: loop body
LE: loop exit
PB: predicated region body
PF: predicated region fallthrough
CT: control target
= control target key end

     0   :  { %s728_s21 = smov 0   ;;  %s900_s0 = inlined_call_operand.vmem [shape: f32[2,80,16], index: 0, kind: input, shape index: {}]   ;;  %s901_s1 = inlined_call_operand.vmem [shape: f32[40,80], index: 1, kind: input, shape index: {}]   ;;  %s902_s2 = inlined_call_operand.vmem [shape: f32[40,1], index: 2, kind: input, shape index: {}]   ;;  %s903_s3 = inlined_call_operand.vmem [shape: f32[80,40], index: 3, kind: input, shape index: {}]   ;;  %s904_s4 = inlined_call_operand.vmem [shape: f32[80,1], index: 4, kind: input, shape index: {}]   ;;  %s905_s5 = inlined_call_operand.vmem [shape: f32[2,40,16], index: 5, kind: output, shape index: {0}]   ;;  %s906_s6 = inlined_call_operand.vmem [shape: f32[2,80,16], index: 6, kind: output, shape index: {1}]  }
   0x1 LB: > { %s625_s22 = sadd.s32 4294967295, %s690_s21   ;;  %p629_p0 = scmp.ge.s32.totalorder %s690_s21, 1  ;;  %s690_s21 = sphi %s728_s21, %s17_s21  }
   0x2   : > { %p215_p1 = scmp.lt.s32.totalorder %s690_s21, 3 }
   0x4   : > { %p216_p2 = pnand %p629_p0, %p215_p1 }
   0x5   : > { %p250_p3 = scmp.lt.s32.totalorder (!%p216_p2), %s625_s22, 1 }
   0x6   : > { %219 = sbr.rel (%p216_p2) target bundleno = 374 (0x176), region = 40 }
   0xb   : > { %v284_v0 = vld [vmem:[%s902_s2 + $0x20] sm:$0xff]  ;;  %v282_v1 = vld [vmem:[%s902_s2 + $0x10] sm:$0xff]  ;;  %v692_v2 = vmov 0   ;;  %s908_s22 = smov (!%p250_p3, %s625_s22), 1  ;;  %v283_v5 = vld [vmem:[%s902_s2 + $0x18] sm:$0xff]  ;;  %vm310_vm0 = vcmask 654336  }
   0xc   : > { %681 = vset.pattern.permute.xlu0 %v692_v2  ;;  %682 = vset.pattern.permute.xlu1 %v692_v2  ;;  %s670_s27 = smul.u32 80, %s908_s22  ;;  %v281_v6 = vld [vmem:[%s902_s2 + $0x8] sm:$0xff]  ;;  %v381_v12 = vld [vmem:[%s904_s4 + $0x10] sm:$0xff]  ;;  %v280_v15 = vld [vmem:[%s902_s2] sm:$0xff]  ;;  %vm363_vm1 = vcmask 130048   ;;  %vm439_vm2 = vcmask 326656  }
   0xd   : > { %307 = vperm.xlu0 %681, %v284_v0   ;;  %297 = vperm.xlu1 %682, %v282_v1   ;;  %v380_v11 = vld [vmem:[%s904_s4 + $0x8] sm:$0xff]  ;;  %v383_v18 = vld [vmem:[%s904_s4 + $0x20] sm:$0xff]  ;;  %v386_v23 = vld [vmem:[%s904_s4 + $0x38] sm:$0xff]  ;;  %s671_s24 = smul.u32 40, %s908_s22 }
   0xe   : > { %683 = vset.pattern.permute.xlu2 %v692_v2  ;;  %s750_s30 = scalar_lea.vmem %s900_s0, %s670_s27  ;;  %v266_v19 = vld [vmem:[%s901_s1 + $0x8] sm:$0xff]  ;;  %v265_v21 = vld [vmem:[%s901_s1] sm:$0xff]  ;;  %v267_v24 = vld [vmem:[%s901_s1 + $0x10] sm:$0xff] }
   0xf   : > { %v279_v3 = vld [vmem:[%s750_s30 + $0x48] sm:$0xff]  ;;  %v278_v4 = vld [vmem:[%s750_s30 + $0x40] sm:$0xff]  ;;  %v277_v7 = vld [vmem:[%s750_s30 + $0x38] sm:$0xff]  ;;  %287 = vperm.xlu2 %683, %v280_v15   ;;  %s259_s28 = scalar_lea.vmem %s905_s5, %s671_s24 }
  0x10   : > { %650 = vmatpush.msra.mxu3 %v279_v3  ;;  %332 = vmatpush.msra.mxu0 %v279_v3  ;;  %v276_v8 = vld [vmem:[%s750_s30 + $0x30] sm:$0xff]  ;;  %v275_v9 = vld [vmem:[%s750_s30 + $0x28] sm:$0xff]  ;;  %v274_v10 = vld [vmem:[%s750_s30 + $0x20] sm:$0xff] }
  0x11   : > { %v273_v13 = vld [vmem:[%s750_s30 + $0x18] sm:$0xff]  ;;  %v272_v14 = vld [vmem:[%s750_s30 + $0x10] sm:$0xff]  ;;  %v271_v16 = vld [vmem:[%s750_s30 + $0x8] sm:$0xff] }
  0x12   : > { %651 = vmatpush.msra.mxu3 %v278_v4  ;;  %333 = vmatpush.msra.mxu0 %v278_v4  ;;  %v270_v17 = vld [vmem:[%s750_s30] sm:$0xff]  ;;  %v384_v20 = vld [vmem:[%s904_s4 + $0x28] sm:$0xff]  ;;  %v382_v26 = vld [vmem:[%s904_s4 + $0x18] sm:$0xff]  ;;  %s875_s30 = scalar_lea.vmem %s906_s6, %s670_s27 }
  0x13   : > { %v379_v22 = vld [vmem:[%s904_s4] sm:$0xff]  ;;  %v268_v27 = vld [vmem:[%s901_s1 + $0x18] sm:$0xff]  ;;  %v385_v28 = vld [vmem:[%s904_s4 + $0x30] sm:$0xff] }
  0x14   : > { %652 = vmatpush.msra.mxu3 %v277_v7  ;;  %334 = vmatpush.msra.mxu0 %v277_v7  ;;  %v387_v25 = vld [vmem:[%s904_s4 + $0x40] sm:$0xff]  ;;  %v388_v30 = vld [vmem:[%s904_s4 + $0x48] sm:$0xff]  ;;  %v371_v54 = vld [vmem:[%s903_s3 + $0x10] sm:$0xff] }
  0x15   : > { %302 = vperm.xlu0 %681, %v283_v5   ;;  %292 = vperm.xlu1 %682, %v281_v6   ;;  %v269_v29 = vld [vmem:[%s901_s1 + $0x20] sm:$0xff]  ;;  %v370_v52 = vld [vmem:[%s903_s3 + $0x8] sm:$0xff]  ;;  %v375_v55 = vld [vmem:[%s903_s3 + $0x30] sm:$0xff] }
  0x16   : > { %653 = vmatpush.msra.mxu3 %v276_v8  ;;  %335 = vmatpush.msra.mxu0 %v276_v8  ;;  %v369_v51 = vld [vmem:[%s903_s3] sm:$0xff]  ;;  %v374_v53 = vld [vmem:[%s903_s3 + $0x28] sm:$0xff]  ;;  %v372_v56 = vld [vmem:[%s903_s3 + $0x18] sm:$0xff] }
  0x17   : > { %391 = vperm.xlu2 %683, %v379_v22   ;;  %v376_v57 = vld [vmem:[%s903_s3 + $0x38] sm:$0xff]  ;;  %v373_v58 = vld [vmem:[%s903_s3 + $0x20] sm:$0xff]  ;;  %v378_v60 = vld [vmem:[%s903_s3 + $0x48] sm:$0xff] }
  0x18   : > { %654 = vmatpush.msra.mxu3 %v275_v9  ;;  %336 = vmatpush.msra.mxu0 %v275_v9  ;;  %v377_v59 = vld [vmem:[%s903_s3 + $0x40] sm:$0xff] }
  0x1a   : > { %655 = vmatpush.msra.mxu3 %v274_v10  ;;  %337 = vmatpush.msra.mxu0 %v274_v10 }
  0x1c   : > { %656 = vmatpush.msra.mxu3 %v273_v13  ;;  %338 = vmatpush.msra.mxu0 %v273_v13 }
  0x1d   : > { %396 = vperm.xlu0 %681, %v380_v11   ;;  %401 = vperm.xlu1 %682, %v381_v12  }
  0x1e   : > { %657 = vmatpush.msra.mxu3 %v272_v14  ;;  %339 = vmatpush.msra.mxu0 %v272_v14 }
  0x1f   : > { %406 = vperm.xlu2 %683, %v382_v26  }
  0x20   : > { %658 = vmatpush.msra.mxu3 %v271_v16  ;;  %340 = vmatpush.msra.mxu0 %v271_v16 }
  0x22   : > { %659 = vmatpush.msra.mxu3 %v270_v17  ;;  %341 = vmatpush.msra.mxu0 %v270_v17 }
  0x23   : > { %634 = vmatmul.msk.f32.vlgmr.msra.gmra.mxu3 %vm310_vm0, %v266_v19  ;;  %633 = vmatmul.msk.f32.vlgmr.msra.gmra.mxu0 %vm310_vm0, %v265_v21 }
  0x25   : > { %411 = vperm.xlu0 %681, %v383_v18   ;;  %416 = vperm.xlu1 %682, %v384_v20  }
  0x27   : > { %421 = vperm.xlu2 %683, %v385_v28  }
  0x2b   : > { %635 = vmatmul.msk.f32.gmra.mxu3 %vm310_vm0, %v267_v24 }
  0x2d   : > { %426 = vperm.xlu0 %681, %v386_v23   ;;  %431 = vperm.xlu1 %682, %v387_v25  }
  0x2f   : > { %436 = vperm.xlu2 %683, %v388_v30  }
  0x33   : > { %636 = vmatmul.msk.f32.gmra.mxu3 %vm310_vm0, %v268_v27 }
  0x3b   : > { %637 = vmatmul.msk.f32.gmra.mxu3 %vm310_vm0, %v269_v29 }
  0x69   : > { %v288_v34 = vpop.permute.xlu2 %287 }
  0x71   : > { %v392_v61 = vpop.permute.xlu2 %391 }
  0x79   : > { %v407_v6 = vpop.permute.xlu2 %406 }
  0x7f   : > { %v298_v31 = vpop.permute.xlu1 %297  ;;  %v308_v40 = vpop.permute.xlu0 %307 }
  0x81   : > { %v422_v15 = vpop.permute.xlu2 %421 }
  0x87   : > { %v293_v32 = vpop.permute.xlu1 %292  ;;  %v303_v44 = vpop.permute.xlu0 %302 }
  0x8f   : > { %v402_v62 = vpop.permute.xlu1 %401  ;;  %v397_v0 = vpop.permute.xlu0 %396 }
  0x97   : > { %v417_v7 = vpop.permute.xlu1 %416  ;;  %v412_v14 = vpop.permute.xlu0 %411 }
  0x9f   : > { %v427_v22 = vpop.permute.xlu0 %426  ;;  %v432_v29 = vpop.permute.xlu1 %431 }
  0xa0   : > { %v343_v36 = vpop.f32.mrf.mxu0 }
  0xa1   : > { %v344_v37 = vadd.f32 %v343_v36, %v288_v34 }
  0xa3   : > { %v358_v39 = vmax.f32 %v344_v37, 0.0 }
  0xa5   : > { %364 = vst.msk [vmem:[%s259_s28] sm:$0xff] %vm363_vm1, %v358_v39 }
  0xa6   : > { %v346_v33 = vpop.f32.mrf.mxu3 }
  0xa7   : > { %v347_v35 = vadd.f32 %v346_v33, %v293_v32  ;;  %v437_v33 = vpop.permute.xlu2 %436 }
  0xa9   : > { %v359_v38 = vmax.f32 %v347_v35, 0.0 }
  0xab   : > { %365 = vst.msk [vmem:[%s259_s28 + $0x8] sm:$0xff] %vm363_vm1, %v359_v38 }
  0xae   : > { %v349_v41 = vpop.f32.mrf.mxu3 }
  0xaf   : > { %v350_v42 = vadd.f32 %v349_v41, %v298_v31 }
  0xb1   : > { %v360_v43 = vmax.f32 %v350_v42, 0.0 }
  0xb3   : > { %366 = vst.msk [vmem:[%s259_s28 + $0x10] sm:$0xff] %vm363_vm1, %v360_v43 }
  0xb6   : > { %v352_v45 = vpop.f32.mrf.mxu3 }
  0xb7   : > { %v353_v46 = vadd.f32 %v352_v45, %v303_v44 }
  0xb9   : > { %v361_v47 = vmax.f32 %v353_v46, 0.0 }
  0xbb   : > { %367 = vst.msk [vmem:[%s259_s28 + $0x18] sm:$0xff] %vm363_vm1, %v361_v47 }
  0xbe   : > { %v355_v48 = vpop.f32.mrf.mxu3 }
  0xbf   : > { %v356_v49 = vadd.f32 %v355_v48, %v308_v40 }
  0xc1   : > { %v362_v50 = vmax.f32 %v356_v49, 0.0 }
  0xc3   : > { %368 = vst.msk [vmem:[%s259_s28 + $0x20] sm:$0xff] %vm363_vm1, %v362_v50  ;;  %481 = vmatpush.msrb.mxu0 %v362_v50  ;;  %660 = vmatpush.msra.mxu1 %v362_v50 }
  0xc4   : > { %661 = vmatpush.msra.mxu2 %v362_v50 }
  0xc5   : > { %482 = vmatpush.msrb.mxu0 %v361_v47  ;;  %662 = vmatpush.msra.mxu1 %v361_v47 }
  0xc6   : > { %663 = vmatpush.msra.mxu2 %v361_v47 }
  0xc7   : > { %483 = vmatpush.msrb.mxu0 %v360_v43  ;;  %664 = vmatpush.msra.mxu1 %v360_v43 }
  0xc8   : > { %665 = vmatpush.msra.mxu2 %v360_v43 }
  0xc9   : > { %484 = vmatpush.msrb.mxu0 %v359_v38  ;;  %666 = vmatpush.msra.mxu1 %v359_v38 }
  0xca   : > { %667 = vmatpush.msra.mxu2 %v359_v38 }
  0xcb   : > { %485 = vmatpush.msrb.mxu0 %v358_v39  ;;  %668 = vmatpush.msra.mxu1 %v358_v39 }
  0xcc   : > { %669 = vmatpush.msra.mxu2 %v358_v39  ;;  %638 = vmatmul.msk.f32.vlgmr.msrb.gmra.mxu0 %vm439_vm2, %v369_v51 }
  0xcd   : > { %639 = vmatmul.msk.f32.vlgmr.msra.gmra.mxu1 %vm439_vm2, %v370_v52  ;;  %643 = vmatmul.msk.f32.vlgmr.msra.gmra.mxu2 %vm439_vm2, %v374_v53 }
  0xd5   : > { %640 = vmatmul.msk.f32.gmra.mxu1 %vm439_vm2, %v371_v54  ;;  %644 = vmatmul.msk.f32.gmra.mxu2 %vm439_vm2, %v375_v55 }
  0xdd   : > { %641 = vmatmul.msk.f32.gmra.mxu1 %vm439_vm2, %v372_v56  ;;  %645 = vmatmul.msk.f32.gmra.mxu2 %vm439_vm2, %v376_v57 }
  0xe5   : > { %642 = vmatmul.msk.f32.gmra.mxu1 %vm439_vm2, %v373_v58  ;;  %646 = vmatmul.msk.f32.gmra.mxu2 %vm439_vm2, %v377_v59 }
  0xed   : > { %647 = vmatmul.msk.f32.gmra.mxu2 %vm439_vm2, %v378_v60 }
 0x149   : > { %v487_v63 = vpop.f32.mrf.mxu0 }
 0x14a   : > { %v488_v1 = vadd.f32 %v487_v63, %v392_v61  ;;  %v490_v2 = vpop.f32.mrf.mxu1 }
 0x14b   : > { %v491_v3 = vadd.f32 %v490_v2, %v397_v0 }
 0x14c   : > { %v517_v4 = vmax.f32 %v488_v1, 0.0 }
 0x14d   : > { %v518_v5 = vmax.f32 %v491_v3, 0.0 }
 0x14e   : > { %527 = vst.msk [vmem:[%s875_s30] sm:$0xff] %vm363_vm1, %v517_v4 }
 0x14f   : > { %528 = vst.msk [vmem:[%s875_s30 + $0x8] sm:$0xff] %vm363_vm1, %v518_v5 }
 0x150   : > { %v502_v8 = vpop.f32.mrf.mxu2 }
 0x151   : > { %v503_v9 = vadd.f32 %v502_v8, %v417_v7 }
 0x152   : > { %v493_v10 = vpop.f32.mrf.mxu1 }
 0x153   : > { %v522_v11 = vmax.f32 %v503_v9, 0.0  ;;  %v494_v12 = vadd.f32 %v493_v10, %v402_v62 }
 0x155   : > { %532 = vst.msk [vmem:[%s875_s30 + $0x28] sm:$0xff] %vm363_vm1, %v522_v11  ;;  %v519_v13 = vmax.f32 %v494_v12, 0.0 }
 0x157   : > { %529 = vst.msk [vmem:[%s875_s30 + $0x10] sm:$0xff] %vm363_vm1, %v519_v13 }
 0x158   : > { %v505_v16 = vpop.f32.mrf.mxu2 }
 0x159   : > { %v506_v17 = vadd.f32 %v505_v16, %v422_v15 }
 0x15a   : > { %v496_v18 = vpop.f32.mrf.mxu1 }
 0x15b   : > { %v523_v19 = vmax.f32 %v506_v17, 0.0  ;;  %v497_v20 = vadd.f32 %v496_v18, %v407_v6 }
 0x15d   : > { %533 = vst.msk [vmem:[%s875_s30 + $0x30] sm:$0xff] %vm363_vm1, %v523_v19  ;;  %v520_v21 = vmax.f32 %v497_v20, 0.0 }
 0x15f   : > { %530 = vst.msk [vmem:[%s875_s30 + $0x18] sm:$0xff] %vm363_vm1, %v520_v21 }
 0x160   : > { %v508_v23 = vpop.f32.mrf.mxu2 }
 0x161   : > { %v509_v24 = vadd.f32 %v508_v23, %v427_v22 }
 0x162   : > { %v499_v25 = vpop.f32.mrf.mxu1 }
 0x163   : > { %v524_v26 = vmax.f32 %v509_v24, 0.0  ;;  %v500_v27 = vadd.f32 %v499_v25, %v412_v14 }
 0x165   : > { %534 = vst.msk [vmem:[%s875_s30 + $0x38] sm:$0xff] %vm363_vm1, %v524_v26  ;;  %v521_v28 = vmax.f32 %v500_v27, 0.0 }
 0x167   : > { %531 = vst.msk [vmem:[%s875_s30 + $0x20] sm:$0xff] %vm363_vm1, %v521_v28 }
 0x168   : > { %v511_v30 = vpop.f32.mrf.mxu2 }
 0x169   : > { %v512_v31 = vadd.f32 %v511_v30, %v432_v29 }
 0x16b   : > { %v525_v32 = vmax.f32 %v512_v31, 0.0 }
 0x16d   : > { %535 = vst.msk [vmem:[%s875_s30 + $0x40] sm:$0xff] %vm363_vm1, %v525_v32 }
 0x170   : > { %v514_v34 = vpop.f32.mrf.mxu2 }
 0x171   : > { %v515_v35 = vadd.f32 %v514_v34, %v437_v33 }
 0x173   : > { %v526_v36 = vmax.f32 %v515_v35, 0.0 }
 0x175   : > { %536 = vst.msk [vmem:[%s875_s30 + $0x48] sm:$0xff] %vm363_vm1, %v526_v36 }
 0x176 PF: > { %s17_s21 = sadd.s32 1, %s690_s21  }
 0x177   : > { %p14_p4 = scmp.ge.s32.totalorder %s17_s21, 4  }
 0x179   :  { %16 = sbr.rel (!%p14_p4) target bundleno = 1 (0x1), region = 82 }

// kernel: net10_forward.9
= control target key start
LH: loop header
LB: loop body
LE: loop exit
PB: predicated region body
PF: predicated region fallthrough
CT: control target
= control target key end

     0   :  { %16 = vsyncpa [#allocation3], 0  ;;  %s978_s0 = inlined_call_operand.vmem [shape: f32[2,320], index: 0, kind: input, shape index: {}]   ;;  %s979_s1 = inlined_call_operand.vmem [shape: f32[320,160], index: 1, kind: input, shape index: {}]   ;;  %s980_s2 = inlined_call_operand.vmem [shape: f32[1,160], index: 2, kind: input, shape index: {}]   ;;  %s981_s3 = inlined_call_operand.vmem [shape: f32[160,50], index: 3, kind: input, shape index: {}]   ;;  %s982_s4 = inlined_call_operand.vmem [shape: f32[1,50], index: 4, kind: input, shape index: {}]   ;;  %s983_s5 = inlined_call_operand.vmem [shape: f32[50,10], index: 5, kind: input, shape index: {}]   ;;  %s984_s6 = inlined_call_operand.vmem [shape: f32[1,10], index: 6, kind: input, shape index: {}]   ;;  %s985_s7 = inlined_call_operand.hbm [shape: f32[2,160], index: 7, kind: output, shape index: {0}]   ;;  %s986_s8 = inlined_call_operand.hbm [shape: f32[2,50], index: 8, kind: output, shape index: {1}]   ;;  %s987_s9 = inlined_call_operand.hbm [shape: f32[2,10], index: 9, kind: output, shape index: {2}]   ;;  %s988_s10 = inlined_call_operand.hbm [shape: f32[2,10], index: 10, kind: output, shape index: {3}]  }
   0x1   :  { %17 = vsyncpa [#allocation5], 0  ;;  %v112_v0 = vld [vmem:[%s979_s1 + $0x270] sm:$0xff]  ;;  %v110_v1 = vld [vmem:[%s979_s1 + $0x260] sm:$0xff]  ;;  %vm127_vm0 = vcmask 523264  }
   0x2   :  { %178 = vmatpush.msra.mxu2 %v112_v0  ;;  %v64_v2 = vld [vmem:[%s979_s1 + $0xf0] sm:$0xff]  ;;  %v62_v4 = vld [vmem:[%s979_s1 + $0xe0] sm:$0xff]  ;;  %v65_v9 = vld [vmem:[%s979_s1 + $0xf8] sm:$0xff] }
   0x3   :  { %v108_v3 = vld [vmem:[%s979_s1 + $0x250] sm:$0xff]  ;;  %130 = vmatpush.msra.mxu0 %v64_v2  ;;  %v94_v7 = vld [vmem:[%s979_s1 + $0x1e0] sm:$0xff]  ;;  %v63_v12 = vld [vmem:[%s979_s1 + $0xe8] sm:$0xff]  ;;  %190 = vmatpush.msra.mxu3 %v65_v9 }
   0x4   :  { %v96_v5 = vld [vmem:[%s979_s1 + $0x1f0] sm:$0xff]  ;;  %179 = vmatpush.msra.mxu2 %v110_v1  ;;  %v106_v8 = vld [vmem:[%s979_s1 + $0x240] sm:$0xff]  ;;  %v61_v16 = vld [vmem:[%s979_s1 + $0xd8] sm:$0xff] }
   0x5   :  { %150 = vmatpush.msra.mxu1 %v96_v5  ;;  %v60_v6 = vld [vmem:[%s979_s1 + $0xd0] sm:$0xff]  ;;  %131 = vmatpush.msra.mxu0 %v62_v4  ;;  %v58_v10 = vld [vmem:[%s979_s1 + $0xc0] sm:$0xff]  ;;  %v59_v20 = vld [vmem:[%s979_s1 + $0xc8] sm:$0xff] }
   0x6   :  { %180 = vmatpush.msra.mxu2 %v108_v3  ;;  %v92_v11 = vld [vmem:[%s979_s1 + $0x1d0] sm:$0xff]  ;;  %v90_v14 = vld [vmem:[%s979_s1 + $0x1c0] sm:$0xff]  ;;  %191 = vmatpush.msra.mxu3 %v63_v12  ;;  %v57_v24 = vld [vmem:[%s979_s1 + $0xb8] sm:$0xff] }
   0x7   :  { %151 = vmatpush.msra.mxu1 %v94_v7  ;;  %v104_v13 = vld [vmem:[%s979_s1 + $0x230] sm:$0xff]  ;;  %132 = vmatpush.msra.mxu0 %v60_v6  ;;  %v102_v17 = vld [vmem:[%s979_s1 + $0x220] sm:$0xff]  ;;  %v97_v27 = vld [vmem:[%s979_s1 + $0x1f8] sm:$0xff] }
   0x8   :  { %181 = vmatpush.msra.mxu2 %v106_v8  ;;  %v56_v15 = vld [vmem:[%s979_s1 + $0xb0] sm:$0xff]  ;;  %v54_v19 = vld [vmem:[%s979_s1 + $0xa0] sm:$0xff]  ;;  %192 = vmatpush.msra.mxu3 %v61_v16  ;;  %v55_v29 = vld [vmem:[%s979_s1 + $0xa8] sm:$0xff] }
   0x9   :  { %152 = vmatpush.msra.mxu1 %v92_v11  ;;  %133 = vmatpush.msra.mxu0 %v58_v10  ;;  %v88_v18 = vld [vmem:[%s979_s1 + $0x1b0] sm:$0xff]  ;;  %v86_v22 = vld [vmem:[%s979_s1 + $0x1a0] sm:$0xff]  ;;  %v95_v31 = vld [vmem:[%s979_s1 + $0x1e8] sm:$0xff] }
   0xa   :  { %182 = vmatpush.msra.mxu2 %v104_v13  ;;  %v100_v21 = vld [vmem:[%s979_s1 + $0x210] sm:$0xff]  ;;  %v98_v25 = vld [vmem:[%s979_s1 + $0x200] sm:$0xff]  ;;  %193 = vmatpush.msra.mxu3 %v59_v20  ;;  %v53_v33 = vld [vmem:[%s979_s1 + $0x98] sm:$0xff] }
   0xb   :  { %153 = vmatpush.msra.mxu1 %v90_v14  ;;  %134 = vmatpush.msra.mxu0 %v56_v15  ;;  %v52_v23 = vld [vmem:[%s979_s1 + $0x90] sm:$0xff]  ;;  %v50_v28 = vld [vmem:[%s979_s1 + $0x80] sm:$0xff]  ;;  %v93_v35 = vld [vmem:[%s979_s1 + $0x1d8] sm:$0xff] }
   0xc   :  { %183 = vmatpush.msra.mxu2 %v102_v17  ;;  %v84_v26 = vld [vmem:[%s979_s1 + $0x190] sm:$0xff]  ;;  %194 = vmatpush.msra.mxu3 %v57_v24  ;;  %v82_v30 = vld [vmem:[%s979_s1 + $0x180] sm:$0xff]  ;;  %v51_v37 = vld [vmem:[%s979_s1 + $0x88] sm:$0xff] }
   0xd   :  { %154 = vmatpush.msra.mxu1 %v88_v18  ;;  %135 = vmatpush.msra.mxu0 %v54_v19  ;;  %v48_v32 = vld [vmem:[%s979_s1 + $0x70] sm:$0xff]  ;;  %v46_v36 = vld [vmem:[%s979_s1 + $0x60] sm:$0xff]  ;;  %v91_v39 = vld [vmem:[%s979_s1 + $0x1c8] sm:$0xff] }
   0xe   :  { %184 = vmatpush.msra.mxu2 %v100_v21  ;;  %v80_v34 = vld [vmem:[%s979_s1 + $0x170] sm:$0xff]  ;;  %195 = vmatpush.msra.mxu3 %v55_v29  ;;  %v78_v38 = vld [vmem:[%s979_s1 + $0x160] sm:$0xff]  ;;  %v49_v41 = vld [vmem:[%s979_s1 + $0x78] sm:$0xff] }
   0xf   :  { %155 = vmatpush.msra.mxu1 %v86_v22  ;;  %136 = vmatpush.msra.mxu0 %v52_v23  ;;  %v44_v40 = vld [vmem:[%s979_s1 + $0x50] sm:$0xff]  ;;  %v89_v43 = vld [vmem:[%s979_s1 + $0x1b8] sm:$0xff]  ;;  %v42_v44 = vld [vmem:[%s979_s1 + $0x40] sm:$0xff] }
  0x10   :  { %185 = vmatpush.msra.mxu2 %v98_v25  ;;  %196 = vmatpush.msra.mxu3 %v53_v33  ;;  %v76_v42 = vld [vmem:[%s979_s1 + $0x150] sm:$0xff]  ;;  %v33_v45 = vld [vmem:[%s978_s0] sm:$0x3f]  ;;  %v47_v46 = vld [vmem:[%s979_s1 + $0x68] sm:$0xff] }
  0x11   :  { %156 = vmatpush.msra.mxu1 %v84_v26  ;;  %137 = vmatpush.msra.mxu0 %v50_v28  ;;  %v74_v47 = vld [vmem:[%s979_s1 + $0x140] sm:$0xff]  ;;  %121 = vst [vmem:[#allocation1] ss:$4 sm:$0xff] %v33_v45  ;;  %v87_v48 = vld [vmem:[%s979_s1 + $0x1a8] sm:$0xff]  ;;  %v40_v49 = vld [vmem:[%s979_s1 + $0x30] sm:$0xff] }
  0x12   :  { %210 = vmatpush.msrb.mxu2 %v97_v27  ;;  %197 = vmatpush.msra.mxu3 %v51_v37  ;;  %v45_v50 = vld [vmem:[%s979_s1 + $0x58] sm:$0xff]  ;;  %v72_v51 = vld [vmem:[%s979_s1 + $0x130] sm:$0xff]  ;;  %v38_v53 = vld [vmem:[%s979_s1 + $0x20] sm:$0xff] }
  0x13   :  { %157 = vmatpush.msra.mxu1 %v82_v30  ;;  %138 = vmatpush.msra.mxu0 %v48_v32  ;;  %v85_v52 = vld [vmem:[%s979_s1 + $0x198] sm:$0xff]  ;;  %v43_v54 = vld [vmem:[%s979_s1 + $0x48] sm:$0xff]  ;;  %v70_v55 = vld [vmem:[%s979_s1 + $0x120] sm:$0xff] }
  0x14   :  { %211 = vmatpush.msrb.mxu2 %v95_v31  ;;  %198 = vmatpush.msra.mxu3 %v49_v41  ;;  %v83_v56 = vld [vmem:[%s979_s1 + $0x188] sm:$0xff]  ;;  %v36_v57 = vld [vmem:[%s979_s1 + $0x10] sm:$0xff]  ;;  %v41_v58 = vld [vmem:[%s979_s1 + $0x38] sm:$0xff] }
  0x15   :  { %158 = vmatpush.msra.mxu1 %v80_v34  ;;  %139 = vmatpush.msra.mxu0 %v46_v36  ;;  %v81_v59 = vld [vmem:[%s979_s1 + $0x178] sm:$0xff]  ;;  %v34_v60 = vld [vmem:[%s979_s1] sm:$0xff]  ;;  %v68_v62 = vld [vmem:[%s979_s1 + $0x110] sm:$0xff] }
  0x16   :  { %212 = vmatpush.msrb.mxu2 %v93_v35  ;;  %199 = vmatpush.msra.mxu3 %v47_v46  ;;  %v39_v63 = vld [vmem:[%s979_s1 + $0x28] sm:$0xff]  ;;  %v113_v1 = vld [vmem:[%s979_s1 + $0x278] sm:$0xff]  ;;  %v66_v3 = vld [vmem:[%s979_s1 + $0x100] sm:$0xff] }
  0x17   :  { %159 = vmatpush.msra.mxu1 %v78_v38  ;;  %140 = vmatpush.msra.mxu0 %v44_v40  ;;  %v79_v0 = vld [vmem:[%s979_s1 + $0x168] sm:$0xff]  ;;  %v77_v4 = vld [vmem:[%s979_s1 + $0x158] sm:$0xff] }
  0x18   :  { %213 = vmatpush.msrb.mxu2 %v91_v39  ;;  %200 = vmatpush.msra.mxu3 %v45_v50  ;;  %v806_v61 = vld.sshfl [vmem:[#allocation1 + $0x10] sm:$0xff pattern:$0x73625140]  ;;  %v122_v2 = vld.sshfl [vmem:[#allocation1] sm:$0xff pattern:$0x73625140] }
  0x19   :  { %160 = vmatpush.msra.mxu1 %v76_v42  ;;  %141 = vmatpush.msra.mxu0 %v42_v44  ;;  %v37_v5 = vld [vmem:[%s979_s1 + $0x18] sm:$0xff] }
  0x1a   :  { %214 = vmatpush.msrb.mxu2 %v89_v43  ;;  %201 = vmatpush.msra.mxu3 %v43_v54 }
  0x1b   :  { %161 = vmatpush.msra.mxu1 %v74_v47  ;;  %142 = vmatpush.msra.mxu0 %v40_v49 }
  0x1c   :  { %215 = vmatpush.msrb.mxu2 %v87_v48  ;;  %202 = vmatpush.msra.mxu3 %v41_v58 }
  0x1d   :  { %162 = vmatpush.msra.mxu1 %v72_v51  ;;  %143 = vmatpush.msra.mxu0 %v38_v53 }
  0x1e   :  { %216 = vmatpush.msrb.mxu2 %v85_v52  ;;  %203 = vmatpush.msra.mxu3 %v39_v63 }
  0x1f   :  { %163 = vmatpush.msra.mxu1 %v70_v55  ;;  %144 = vmatpush.msra.mxu0 %v36_v57 }
  0x20   :  { %217 = vmatpush.msrb.mxu2 %v83_v56 }
  0x21   :  { %447 = vmatmul.msk.f32.vlgmr.msra.gmra.mxu2 %vm127_vm0, %v806_v61  ;;  %145 = vmatpush.msra.mxu0 %v34_v60 }
  0x22   :  { %218 = vmatpush.msrb.mxu2 %v81_v59  ;;  %164 = vmatpush.msra.mxu1 %v68_v62 }
  0x23   :  { %18 = vsyncpa [#allocation8], 0  ;;  %238 = vmatpush.msrb.mxu0 %v113_v1  ;;  %v111_v6 = vld [vmem:[%s979_s1 + $0x268] sm:$0xff]  ;;  %204 = vmatpush.msra.mxu3 %v37_v5  ;;  %v109_v10 = vld [vmem:[%s979_s1 + $0x258] sm:$0xff]  ;;  %vm285_vm1 = vcmask 261120   ;;  %vm255_vm2 = vcmask 1041408  }
  0x24   :  { %219 = vmatpush.msrb.mxu2 %v79_v0  ;;  %v123_v7 = vld.sshfl [vmem:[#allocation1 + $0x8] sm:$0xff pattern:$0x73625140]  ;;  %146 = vmatmul.f32.vlgmr.msra.gmra.mxu0 %v122_v2  ;;  %v73_v11 = vld [vmem:[%s979_s1 + $0x138] sm:$0xff]  ;;  %v275_v15 = vld [vmem:[%s981_s3 + $0x70] sm:$0xff]  ;;  %vm258_vm3 = vcmask 257026  }
  0x25   :  { %v75_v8 = vld [vmem:[%s979_s1 + $0x148] sm:$0xff]  ;;  %165 = vmatpush.msra.mxu1 %v66_v3  ;;  %239 = vmatpush.msrb.mxu0 %v111_v6  ;;  %v276_v12 = vld [vmem:[%s981_s3 + $0x78] sm:$0xff]  ;;  %v273_v21 = vld [vmem:[%s981_s3 + $0x60] sm:$0xff]  ;;  %vm342_vm5 = vcmask 408576   ;;  %vm329_vm6 = vcmask 402432   ;;  %vm369_vm7 = vcmask 74752  }
  0x26   :  { %v35_v9 = vld [vmem:[%s979_s1 + $0x8] sm:$0xff]  ;;  %220 = vmatpush.msrb.mxu2 %v77_v4  ;;  %166 = vmatmul.f32.vlgmr.msra.gmra.mxu1 %v123_v7  ;;  %v105_v16 = vld [vmem:[%s979_s1 + $0x238] sm:$0xff]  ;;  %v271_v25 = vld [vmem:[%s981_s3 + $0x50] sm:$0xff]  ;;  %s391_s28 = sshll.u32 %s985_s7, 4  ;;  %s565_s29 = smov [#allocation2]   ;;  %s392_s28 = int_to_ptr.hbm [resolvable:$true] %s391_s28 }
  0x27   :  { %205 = vmatpush.msra.mxu3 %v35_v9  ;;  %v107_v13 = vld [vmem:[%s979_s1 + $0x248] sm:$0xff]  ;;  %240 = vmatpush.msrb.mxu0 %v109_v10  ;;  %v69_v17 = vld [vmem:[%s979_s1 + $0x118] sm:$0xff]  ;;  %v269_v27 = vld [vmem:[%s981_s3 + $0x40] sm:$0xff]  ;;  %s413_s12 = sshll.u32 %s987_s9, 4  ;;  %s567_s0 = smov [#allocation7]   ;;  %s414_s12 = int_to_ptr.hbm [resolvable:$true] %s413_s12 }
  0x28   :  { %221 = vmatpush.msrb.mxu2 %v75_v8  ;;  %v71_v14 = vld [vmem:[%s979_s1 + $0x128] sm:$0xff]  ;;  %206 = vmatmul.f32.vlgmr.msra.gmra.mxu3 %v122_v2  ;;  %v101_v22 = vld [vmem:[%s979_s1 + $0x218] sm:$0xff]  ;;  %v267_v29 = vld [vmem:[%s981_s3 + $0x30] sm:$0xff]  ;;  %s422_s13 = sshll.u32 %s567_s0, 4  ;;  %s424_s15 = sshll.u32 %s988_s10, 4  ;;  %s423_s13 = int_to_ptr.vmem [resolvable:$true] %s422_s13  ;;  %s425_s15 = int_to_ptr.hbm [resolvable:$true] %s424_s15 }
  0x29   :  { %288 = vmatpush.msrb.mxu1 %v276_v12  ;;  %241 = vmatpush.msrb.mxu0 %v107_v13  ;;  %v274_v18 = vld [vmem:[%s981_s3 + $0x68] sm:$0xff]  ;;  %v272_v23 = vld [vmem:[%s981_s3 + $0x58] sm:$0xff]  ;;  %v265_v31 = vld [vmem:[%s981_s3 + $0x20] sm:$0xff] }
  0x2a   :  { %222 = vmatpush.msrb.mxu2 %v73_v11  ;;  %v103_v19 = vld [vmem:[%s979_s1 + $0x228] sm:$0xff]  ;;  %v268_v28 = vld [vmem:[%s981_s3 + $0x38] sm:$0xff]  ;;  %v263_v33 = vld [vmem:[%s981_s3 + $0x10] sm:$0xff] }
  0x2b   :  { %289 = vmatpush.msrb.mxu1 %v275_v15  ;;  %v67_v20 = vld [vmem:[%s979_s1 + $0x108] sm:$0xff]  ;;  %242 = vmatpush.msrb.mxu0 %v105_v16  ;;  %v264_v32 = vld [vmem:[%s981_s3 + $0x18] sm:$0xff]  ;;  %v261_v35 = vld [vmem:[%s981_s3] sm:$0xff] }
  0x2c   :  { %223 = vmatpush.msrb.mxu2 %v71_v14  ;;  %v99_v24 = vld [vmem:[%s979_s1 + $0x208] sm:$0xff]  ;;  %v280_v36 = vld [vmem:[%s981_s3 + $0x98] sm:$0xff]  ;;  %v279_v37 = vld [vmem:[%s981_s3 + $0x90] sm:$0xff]  ;;  %s402_s1 = sshll.u32 %s986_s8, 4  ;;  %s403_s1 = int_to_ptr.hbm [resolvable:$true] %s402_s1 }
  0x2d   :  { %290 = vmatpush.msrb.mxu1 %v274_v18  ;;  %243 = vmatpush.msrb.mxu0 %v103_v19  ;;  %v270_v26 = vld [vmem:[%s981_s3 + $0x48] sm:$0xff]  ;;  %v277_v39 = vld [vmem:[%s981_s3 + $0x80] sm:$0xff]  ;;  %vm259_vm4 = vmor %vm258_vm3, %vm255_vm2 }
  0x2e   :  { %224 = vmatpush.msrb.mxu2 %v69_v17  ;;  %v266_v30 = vld [vmem:[%s981_s3 + $0x28] sm:$0xff]  ;;  %320 = vmatpush.msrb.mxu3 %v280_v36  ;;  %v114_v40 = vld [vmem:[%s980_s2] sm:$0x3]  ;;  %v337_v59 = vld [vmem:[%s983_s5 + $0x30] sm:$0x3]  ;;  %s389_s2 = sshll.u32 %s565_s29, 4  ;;  %s390_s2 = int_to_ptr.vmem [resolvable:$true] %s389_s2 }
  0x2f   :  { %291 = vmatpush.msrb.mxu1 %v273_v21  ;;  %244 = vmatpush.msrb.mxu0 %v101_v22  ;;  %v262_v34 = vld [vmem:[%s981_s3 + $0x8] sm:$0xff]  ;;  %v116_v41 = vperm.slane %v114_v40, 0  ;;  %v117_v49 = vperm.slane %v114_v40, 1  ;;  %v334_v62 = vld [vmem:[%s983_s5 + $0x18] sm:$0xff]  ;;  %v333_v63 = vld [vmem:[%s983_s5 + $0x10] sm:$0xff] }
  0x30   :  { %225 = vmatpush.msrb.mxu2 %v67_v20  ;;  %321 = vmatpush.msrb.mxu3 %v279_v37  ;;  %v278_v38 = vld [vmem:[%s981_s3 + $0x88] sm:$0xff]  ;;  %v331_v1 = vld [vmem:[%s983_s5] sm:$0xff]  ;;  %s566_s3 = smov [#allocation6]  }
  0x31   :  { %226 = vmatmul.f32.vlgmr.msrb.gmra.mxu2 %v123_v7  ;;  %292 = vmatpush.msrb.mxu1 %v272_v23  ;;  %v336_v60 = vld [vmem:[%s983_s5 + $0x28] sm:$0xff]  ;;  %v456_v2 = vld [vmem:[%s982_s4] ss:$0 sm:$0xff]  ;;  %s564_s4 = smov [#allocation4]   ;;  %s411_s30 = sshll.u32 %s566_s3, 4  ;;  %s412_s30 = int_to_ptr.vmem [resolvable:$true] %s411_s30 }
  0x32   :  { %245 = vmatpush.msrb.mxu0 %v99_v24  ;;  %322 = vmatpush.msrb.mxu3 %v278_v38  ;;  %v332_v0 = vld [vmem:[%s983_s5 + $0x8] sm:$0xff]  ;;  %v457_v8 = vld [vmem:[%s984_s6] ss:$0 sm:$0xff] }
  0x33   :  { %448 = vmatmul.msk.f32.vlgmr.msrb.gmra.mxu0 %vm127_vm0, %v806_v61  ;;  %293 = vmatpush.msrb.mxu1 %v271_v25  ;;  %v335_v61 = vld [vmem:[%s983_s5 + $0x20] sm:$0xff]  ;;  %s400_s5 = sshll.u32 %s564_s4, 4  ;;  %s401_s5 = int_to_ptr.vmem [resolvable:$true] %s400_s5 }
  0x34   :  { %323 = vmatpush.msrb.mxu3 %v277_v39 }
  0x35   :  { %294 = vmatpush.msrb.mxu1 %v270_v26 }
  0x36   :  { %450 = vmatpush.msk.msra.mxu3 %vm255_vm2, %v337_v59 }
  0x37   :  { %295 = vmatpush.msrb.mxu1 %v269_v27 }
  0x38   :  { %359 = vmatpush.msra.mxu3 %v336_v60 }
  0x39   :  { %296 = vmatpush.msrb.mxu1 %v268_v28 }
  0x3a   :  { %360 = vmatpush.msra.mxu3 %v335_v61 }
  0x3b   :  { %297 = vmatpush.msrb.mxu1 %v267_v29 }
  0x3c   :  { %361 = vmatpush.msra.mxu3 %v334_v62 }
  0x3d   :  { %298 = vmatpush.msrb.mxu1 %v266_v30 }
  0x3e   :  { %362 = vmatpush.msra.mxu3 %v333_v63 }
  0x3f   :  { %299 = vmatpush.msrb.mxu1 %v265_v31 }
  0x40   :  { %363 = vmatpush.msra.mxu3 %v332_v0 }
  0x41   :  { %300 = vmatpush.msrb.mxu1 %v264_v32 }
  0x42   :  { %364 = vmatpush.msra.mxu3 %v331_v1 }
  0x43   :  { %301 = vmatpush.msrb.mxu1 %v263_v33 }
  0x45   :  { %302 = vmatpush.msrb.mxu1 %v262_v34 }
  0x47   :  { %303 = vmatpush.msrb.mxu1 %v261_v35 }
  0xa1   :  { %v147_v42 = vpop.f32.mrf.mxu0 }
  0xa2   :  { %v148_v43 = vadd.f32 %v147_v42, %v116_v41 }
  0xa3   :  { %v167_v44 = vpop.f32.mrf.mxu1 }
  0xa4   :  { %v187_v45 = vpop.f32.mrf.mxu2  ;;  %v168_v46 = vadd.f32 %v167_v44, %v148_v43 }
  0xa6   :  { %v188_v47 = vadd.f32 %v187_v45, %v168_v46 }
  0xa8   :  { %v250_v48 = vmax.f32 %v188_v47, 0.0 }
  0xaa   :  { %304 = vmatmul.f32.vlgmr.msrb.gmra.mxu1 %v250_v48 }
  0xab   :  { %v207_v50 = vpop.f32.mrf.mxu3 }
  0xac   :  { %v208_v51 = vadd.f32 %v207_v50, %v117_v49 }
  0xb0   :  { %v247_v53 = vpop.f32.mrf.mxu0 }
  0xb4   :  { %v227_v52 = vpop.f32.mrf.mxu2 }
  0xb5   :  { %v228_v54 = vadd.f32 %v227_v52, %v208_v51 }
  0xb7   :  { %v248_v55 = vadd.f32 %v247_v53, %v228_v54 }
  0xb9   :  { %v251_v56 = vmax.f32 %v248_v55, 0.0 }
  0xbb   :  { %v254_v57 = vrot.slane %v251_v56, 6  ;;  %449 = vmatmul.msk.f32.vlgmr.msrb.gmra.mxu3 %vm285_vm1, %v251_v56 }
  0xbd   :  { %v256_v58 = vsel %vm255_vm2, %v250_v48, %v254_v57 }
  0xbe   :  { %260 = vst.msk [vmem:[#allocation2] sm:$0xf] %vm259_vm4, %v256_v58 }
  0xbf   :  { %394 = dma.vmem_to_hbm [thread:$0]  %s390_s2, 64, %s392_s28, [#allocation3]  }
 0x127   :  { %v305_v3 = vpop.f32.mrf.mxu1 }
 0x128   :  { %v306_v4 = vadd.f32 %v456_v2, %v305_v3 }
 0x13e   :  { %v325_v5 = vpop.f32.mrf.mxu3 }
 0x13f   :  { %v326_v6 = vadd.f32 %v325_v5, %v306_v4 }
 0x141   :  { %v328_v7 = vmax.f32 %v326_v6, 0.0 }
 0x143   :  { %451 = vmatmul.msk.f32.vlgmr.msra.gmra.mxu3 %vm342_vm5, %v328_v7  ;;  %330 = vst.msk [vmem:[#allocation4] sm:$0x3] %vm329_vm6, %v328_v7 }
 0x144   :  { %405 = dma.vmem_to_hbm [thread:$0]  %s401_s5, 32, %s403_s1, [#allocation5]  }
 0x1c6   :  { %v366_v9 = vpop.f32.mrf.mxu3 }
 0x1c7   :  { %v367_v10 = vadd.f32 %v457_v8, %v366_v9 }
 0x1c9   :  { %v371_v11 = vsel %vm369_vm7, %v367_v10, -inf  ;;  %370 = vst.msk [vmem:[#allocation6] sm:$0x3] %vm369_vm7, %v367_v10 }
 0x1ca   :  { %372 = vmax.xlane.f32.xlu0 %v371_v11  ;;  %416 = dma.vmem_to_hbm [thread:$0]  %s412_s30, 32, %s414_s12, [#allocation5]  }
 0x23d   :  { %v373_v12 = vpop.xlane.xlu0 %372 }
 0x23e   :  { %v374_v13 = vsub.f32 %v367_v10, %v373_v12 }
 0x240   :  { %v375_v14 = vmul.f32 1.442695, %v374_v13 }
 0x242   :  { %458 = vpow2.f32 %v375_v14 }
 0x248   :  { %v459_v15 = vpop.eup %458 }
 0x249   :  { %v377_v16 = vsel %vm369_vm7, %v459_v15, 0.0 }
 0x24a   :  { %378 = vadd.xlane.f32.xlu0 %v377_v16 }
 0x2bd   :  { %v379_v17 = vpop.xlane.xlu0 %378 }
 0x2be   :  { %460 = vlog2.f32 %v379_v17 }
 0x2c4   :  { %v461_v18 = vpop.eup %460 }
 0x2c5   :  { %v381_v19 = vmul.f32 0.6931472, %v461_v18 }
 0x2c7   :  { %v382_v20 = vsub.f32 %v374_v13, %v381_v19 }
 0x2c9   :  { %383 = vst.msk [vmem:[#allocation7] sm:$0x3] %vm369_vm7, %v382_v20 }
 0x2ca   :  { %427 = dma.vmem_to_hbm [thread:$0]  %s423_s13, 32, %s425_s15, [#allocation8]  }
 0x2cb   :  { %558 = dma.done.wait [#allocation3], 64  }
 0x2cc   :  { %559 = vsyncadd [#allocation3], 4294967232 }
 0x2cd   :  { %560 = dma.done.wait [#allocation5], 64  }
 0x2ce   :  { %561 = vsyncadd [#allocation5], 4294967232 }
 0x2cf   :  { %562 = dma.done.wait [#allocation8], 32  }
 0x2d0   :  { %563 = vsyncadd [#allocation8], 4294967264 }
 0x2d1   :  { %444 = vsyncpa [#allocation3], 1 }
 0x2d2   :  { %445 = vsyncpa [#allocation5], 1 }
 0x2d3   :  { %446 = vsyncpa [#allocation8], 1 }

</bundles_post_ra>
